<compile_context>
chip_gen: v6e
topology: v6e:2x2x1
jax: 0.10.0
libtpu: 0.0.40
codegen_flags: <defaults>
</compile_context>

<pallas_src>
import functools

import jax
import jax.numpy as jnp
from jax.experimental import pallas as pl
from jax.experimental.pallas import tpu as pltpu

BN_EPS = 1e-5


def _round_up(n, m):
    return ((n + m - 1) // m) * m


# ---------------------------------------------------------------------------
# Kernel 1: 3x3 conv as ONE stacked-tap MXU matmul + fused BN batch stats,
#           optionally with the previous layer's BN affine + ReLU fused into
#           the input load.
# ---------------------------------------------------------------------------
def _conv3x3_bnstat_kernel(*refs, H, W, pad_off, fuse_in_act):
    if fuse_in_act:
        (x_ref, w_ref, sc_ref, sh_ref, m0_ref, m2_ref,
         y_ref, stat_ref, pad_ref, stk_ref) = refs
    else:
        (x_ref, w_ref, m0_ref, m2_ref,
         y_ref, stat_ref, pad_ref, stk_ref) = refs
        sc_ref = sh_ref = None

    S = H * W
    P = pad_off
    cin = x_ref.shape[0]

    if fuse_in_act:
        # previous layer's BatchNorm affine + ReLU fused into this conv's load
        xf = jnp.maximum(
            x_ref[...].astype(jnp.float32) * sc_ref[...] + sh_ref[...], 0.0)
    else:
        xf = x_ref[...].astype(jnp.float32)

    # Only W+1 halo columns on each side of the centre are ever read by the
    # shifted taps; zero exactly those every step (cheap, megacore-safe — no
    # reliance on scratch persistence across grid steps / cores).
    hw = W + 1
    z = jnp.zeros((3 * cin, hw), pad_ref.dtype)
    pad_ref[:, P - hw:P] = z
    pad_ref[:, P + S:P + S + hw] = z

    # Three centre copies; masks applied ONCE per image, not once per tap.
    #   rows [0, cin)       : unmasked                 -> read by kw == 1 taps
    #   rows [cin, 2cin)    : source col W-1 zeroed    -> read by kw == 0 taps
    #   rows [2cin, 3cin)   : source col 0   zeroed    -> read by kw == 2 taps
    pad_ref[0 * cin:1 * cin, P:P + S] = xf.astype(pad_ref.dtype)
    pad_ref[1 * cin:2 * cin, P:P + S] = (xf * m0_ref[...]).astype(pad_ref.dtype)
    pad_ref[2 * cin:3 * cin, P:P + S] = (xf * m2_ref[...]).astype(pad_ref.dtype)

    # Build the (9*Cin, S) stacked operand: tap t = kh*3 + kw occupies rows
    # [t*cin, (t+1)*cin) and is a static lane-shift of the matching copy.
    for kh in range(3):
        for kw in range(3):
            off = P + (kh - 1) * W + (kw - 1)
            r0 = cin if kw == 0 else (2 * cin if kw == 2 else 0)
            t = kh * 3 + kw
            stk_ref[t * cin:(t + 1) * cin, :] = pad_ref[r0:r0 + cin, off:off + S]

    # One MXU matmul with contraction depth K = 9*Cin (vs nine K=Cin dots).
    acc = jnp.dot(w_ref[...], stk_ref[...], preferred_element_type=jnp.float32)

    y_ref[...] = acc.astype(y_ref.dtype)            # lane-dense store
    # Per-image, per-channel batch statistics from the f32 accumulator,
    # merged into a single (Cout, 2) output block: [:,0]=sum, [:,1]=sum(x^2).
    stat_ref[:, 0:1] = jnp.sum(acc, axis=1, keepdims=True)
    stat_ref[:, 1:2] = jnp.sum(acc * acc, axis=1, keepdims=True)


def conv3x3_stats(x_flat, w_stk, mask_kw0, mask_kw2, H, W,
                  in_scale=None, in_shift=None, out_dtype=jnp.float32):
    """x_flat: (N, Cin, H*W); w_stk: (Cout, 9*Cin) bf16.
    Returns (conv output (N, Cout, H*W) out_dtype, stats (N, Cout, 2) f32)."""
    N, Cin, S = x_flat.shape
    Cout = w_stk.shape[0]
    assert w_stk.shape == (Cout, 9 * Cin)
    assert S == H * W

    fuse = in_scale is not None
    pad_off = _round_up(W + 1, 128)      # lane-aligned centre store
    L = S + 2 * pad_off

    kern = functools.partial(_conv3x3_bnstat_kernel,
                             H=H, W=W, pad_off=pad_off, fuse_in_act=fuse)

    in_specs = [pl.BlockSpec((None, Cin, S), lambda n: (n, 0, 0)),
                pl.BlockSpec((Cout, 9 * Cin), lambda n: (0, 0))]
    inputs = [x_flat, w_stk]
    if fuse:
        in_specs += [pl.BlockSpec((Cin, 1), lambda n: (0, 0)),
                     pl.BlockSpec((Cin, 1), lambda n: (0, 0))]
        inputs += [in_scale, in_shift]
    in_specs += [pl.BlockSpec((1, S), lambda n: (0, 0)),
                 pl.BlockSpec((1, S), lambda n: (0, 0))]
    inputs += [mask_kw0, mask_kw2]

    # Explicit VMEM budget: double-buffered IO blocks + persistent scratch,
    # with 2x margin for tile-padding / internal scratch.
    x_item = jnp.dtype(x_flat.dtype).itemsize
    y_item = jnp.dtype(out_dtype).itemsize
    in_bytes = (Cin * S * x_item + Cout * 9 * Cin * 2 + 2 * S * 4
                + (2 * Cin * 4 if fuse else 0))
    out_bytes = Cout * S * y_item + Cout * 2 * 4
    scratch_bytes = 3 * Cin * L * 2 + 9 * Cin * S * 2
    est = 2 * (in_bytes + out_bytes) + scratch_bytes
    vmem_budget = min(max(2 * est + (4 << 20), 16 << 20), 100 << 20)

    return pl.pallas_call(
        kern,
        out_shape=(jax.ShapeDtypeStruct((N, Cout, S), out_dtype),
                   jax.ShapeDtypeStruct((N, Cout, 2), jnp.float32)),
        grid_spec=pltpu.PrefetchScalarGridSpec(
            num_scalar_prefetch=0,
            grid=(N,),
            in_specs=in_specs,
            out_specs=(pl.BlockSpec((None, Cout, S), lambda n: (n, 0, 0)),
                       pl.BlockSpec((None, Cout, 2), lambda n: (n, 0, 0))),
            scratch_shapes=[pltpu.VMEM((3 * Cin, L), jnp.bfloat16),
                            pltpu.VMEM((9 * Cin, S), jnp.bfloat16)]),
        compiler_params=pltpu.CompilerParams(
            dimension_semantics=("parallel",),
            vmem_limit_bytes=vmem_budget),
    )(*inputs)


# ---------------------------------------------------------------------------
# Kernel 2: final BatchNorm affine + ReLU, in place over conv2's output.
# ---------------------------------------------------------------------------
def _bn_relu_kernel(y_ref, sc_ref, sh_ref, o_ref):
    o_ref[...] = jnp.maximum(y_ref[...] * sc_ref[...] + sh_ref[...], 0.0)


def bn_relu(y_flat, scale, shift):
    N, C, S = y_flat.shape
    est = 2 * (2 * C * S * 4 + 2 * C * 4)
    vmem_budget = min(max(2 * est + (4 << 20), 16 << 20), 100 << 20)
    return pl.pallas_call(
        _bn_relu_kernel,
        out_shape=jax.ShapeDtypeStruct((N, C, S), jnp.float32),
        grid_spec=pltpu.PrefetchScalarGridSpec(
            num_scalar_prefetch=0,
            grid=(N,),
            in_specs=[pl.BlockSpec((None, C, S), lambda n: (n, 0, 0)),
                      pl.BlockSpec((C, 1), lambda n: (0, 0)),
                      pl.BlockSpec((C, 1), lambda n: (0, 0))],
            out_specs=pl.BlockSpec((None, C, S), lambda n: (n, 0, 0))),
        input_output_aliases={0: 0},   # reuse y's HBM buffer for the output
        compiler_params=pltpu.CompilerParams(
            dimension_semantics=("parallel",),
            vmem_limit_bytes=vmem_budget),
    )(y_flat, scale, shift)


# ---------------------------------------------------------------------------
# Plain-JAX glue (tiny, per-channel vectors only)
# ---------------------------------------------------------------------------
def _bn_affine(stats, gamma, beta, count):
    """Fold training-mode BatchNorm (batch stats) into scale/shift (C,1)."""
    s = jnp.sum(stats, axis=0)                         # (C, 2)
    mean = s[:, 0:1] / count
    ex2 = s[:, 1:2] / count
    var = jnp.maximum(ex2 - mean * mean, 0.0)          # clamp f32 cancellation
    inv = jax.lax.rsqrt(var + BN_EPS)
    scale = gamma.reshape(-1, 1) * inv
    shift = beta.reshape(-1, 1) - mean * scale
    return scale, shift


def _prep_conv_weight(w, cin_p, cout_p):
    """torch (Cout,Cin,3,3) -> (Cout_p, 9*Cin_p) bf16; row index = output chan,
    column index = (kh*3+kw)*Cin_p + cin — matches the stacked operand rows."""
    cout, cin = w.shape[0], w.shape[1]
    w = jnp.pad(w, ((0, cout_p - cout), (0, cin_p - cin), (0, 0), (0, 0)))
    w = jnp.transpose(w, (0, 2, 3, 1)).reshape(cout_p, 9 * cin_p)
    return w.astype(jnp.bfloat16)


def _pad_vec(v, n, fill):
    c = v.shape[0]
    if n == c:
        return v
    return jnp.concatenate([v, jnp.full((n - c,), fill, v.dtype)])


def double_conv_forward(x_nchw, params):
    """Conv3x3(pad=1) -> BN(train-mode batch stats) -> ReLU, twice. NCHW in/out."""
    N, Cin, H, W = x_nchw.shape
    S = H * W
    c1 = params['conv1']['w'].shape[0]
    c2 = params['conv2']['w'].shape[0]
    # bf16 sublane tile is (16,128): pad channels to multiples of 16.
    cin_p, c1_p, c2_p = _round_up(Cin, 16), _round_up(c1, 16), _round_up(c2, 16)

    x = x_nchw.astype(jnp.float32)
    if cin_p != Cin:
        x = jnp.pad(x, ((0, 0), (0, cin_p - Cin), (0, 0), (0, 0)))
    x_flat = x.reshape(N, cin_p, S)

    # Source-index masks for the flat-shift wrap-around (shared by both convs):
    #   kw==0 taps read the copy with source column W-1 zeroed,
    #   kw==2 taps read the copy with source column 0   zeroed.
    col = jnp.arange(S, dtype=jnp.int32) % W
    mask_kw0 = (col != W - 1).astype(jnp.float32).reshape(1, S)
    mask_kw2 = (col != 0).astype(jnp.float32).reshape(1, S)

    # --- conv1 + fused batch stats (bias dropped: cancels under train-mode BN).
    # y1 stored bf16 (largest HBM tensor; would be cast to bf16 for conv2 anyway)
    w1 = _prep_conv_weight(params['conv1']['w'], cin_p, c1_p)
    g1 = _pad_vec(params['conv1']['gamma'], c1_p, 1.0)
    b1 = _pad_vec(params['conv1']['beta'], c1_p, 0.0)
    y1, st1 = conv3x3_stats(x_flat, w1, mask_kw0, mask_kw2, H, W,
                            out_dtype=jnp.bfloat16)
    scale1, shift1 = _bn_affine(st1, g1, b1, float(N * S))

    # --- conv2 with conv1's BN affine + ReLU fused into its input load ---
    w2 = _prep_conv_weight(params['conv2']['w'], c1_p, c2_p)
    g2 = _pad_vec(params['conv2']['gamma'], c2_p, 1.0)
    b2 = _pad_vec(params['conv2']['beta'], c2_p, 0.0)
    y2, st2 = conv3x3_stats(y1, w2, mask_kw0, mask_kw2, H, W,
                            in_scale=scale1, in_shift=shift1,
                            out_dtype=jnp.float32)
    scale2, shift2 = _bn_affine(st2, g2, b2, float(N * S))

    out = bn_relu(y2, scale2, shift2)                  # in place over y2 buffer
    out = out.reshape(N, c2_p, H, W)
    return out if c2 == c2_p else out[:, :c2]


# ---------------------------------------------------------------------------
# Parameters (mirrors nn.Conv2d / nn.BatchNorm2d of the PyTorch module)
# ---------------------------------------------------------------------------
def init_params(key, in_ch, out_ch):
    k = jax.random.split(key, 4)

    def conv_p(kw, kb, cin, cout):
        std = (2.0 / (9 * cin)) ** 0.5
        return dict(
            w=jax.random.normal(kw, (cout, cin, 3, 3), jnp.float32) * std,
            # bias exists in the module but cancels exactly under train-mode BN
            b=jax.random.normal(kb, (cout,), jnp.float32) * 0.1,
            gamma=jnp.ones((cout,), jnp.float32),
            beta=jnp.zeros((cout,), jnp.float32),
        )

    return dict(conv1=conv_p(k[0], k[1], in_ch, out_ch),
                conv2=conv_p(k[2], k[3], out_ch, out_ch))


# ---------------------------------------------------------------------------
# Pure-JAX reference (applies the bias, demonstrating the cancellation claim)
# ---------------------------------------------------------------------------
def _reference_double_conv(x, params):
    def block(x, p):
        y = jax.lax.conv_general_dilated(
            x, p['w'], window_strides=(1, 1), padding='SAME',
            dimension_numbers=('NCHW', 'OIHW', 'NCHW'),
            precision=jax.lax.Precision.HIGHEST)
        y = y + p['b'][None, :, None, None]
        mean = jnp.mean(y, axis=(0, 2, 3), keepdims=True)
        var = jnp.var(y, axis=(0, 2, 3), keepdims=True)       # biased, like BN
        yhat = (y - mean) * jax.lax.rsqrt(var + BN_EPS)
        y = p['gamma'][None, :, None, None] * yhat + p['beta'][None, :, None, None]
        return jnp.maximum(y, 0.0)

    return block(block(x, params['conv1']), params['conv2'])


# ---------------------------------------------------------------------------
if __name__ == "__main__":
    key = jax.random.PRNGKey(0)
    kp, kx = jax.random.split(key)

    N, IN_CH, OUT_CH, H, W = 2, 4, 16, 16, 16
    params = init_params(kp, IN_CH, OUT_CH)
    x = jax.random.normal(kx, (N, IN_CH, H, W), jnp.float32)

    fwd = jax.jit(double_conv_forward)
    out = fwd(x, params)
    jax.block_until_ready(out)

    assert out.shape == (N, OUT_CH, H, W), out.shape
    assert bool(jnp.all(jnp.isfinite(out)))

    ref = _reference_double_conv(x, params)
    max_err = float(jnp.max(jnp.abs(out - ref)))
    assert max_err < 0.3, f"max abs error vs reference: {max_err}"

    print("KERNEL_OK")
</pallas_src>

<mosaic_0001>
module attributes {stable_mosaic.version = 11 : i64} {
  func.func @_conv3x3_bnstat_kernel(%arg0: i32, %arg1: memref<1x16x256xf32, #tpu.memory_space<vmem>>, %arg2: memref<16x144xbf16, #tpu.memory_space<vmem>>, %arg3: memref<1x256xf32, #tpu.memory_space<vmem>>, %arg4: memref<1x256xf32, #tpu.memory_space<vmem>>, %arg5: memref<1x16x256xbf16, #tpu.memory_space<vmem>>, %arg6: memref<1x16x2xf32, #tpu.memory_space<vmem>>, %arg7: memref<48x512xbf16, #tpu.memory_space<vmem>>, %arg8: memref<144x256xbf16, #tpu.memory_space<vmem>>) attributes {dimension_semantics = [#tpu.dimension_semantics<parallel>], iteration_bounds = array<i64: 2>, scalar_prefetch = 0 : i64, scratch_operands = 2 : i64, tpu.core_type = #tpu.core_type<tc>, window_params = [{transform_indices = @transform_0, window_bounds = array<i64: 1, 16, 256>}, {pipeline_mode = #tpu.pipeline_mode<synchronous>, transform_indices = @transform_1, window_bounds = array<i64: 16, 144>}, {pipeline_mode = #tpu.pipeline_mode<synchronous>, transform_indices = @transform_2, window_bounds = array<i64: 1, 256>}, {pipeline_mode = #tpu.pipeline_mode<synchronous>, transform_indices = @transform_3, window_bounds = array<i64: 1, 256>}, {transform_indices = @transform_4, window_bounds = array<i64: 1, 16, 256>}, {transform_indices = @transform_5, window_bounds = array<i64: 1, 16, 2>}]} {
    %c0 = arith.constant 0 : index
    %c0_0 = arith.constant 0 : index
    %c0_1 = arith.constant 0 : index
    %0 = vector.load %arg1[%c0, %c0_0, %c0_1] : memref<1x16x256xf32, #tpu.memory_space<vmem>>, vector<1x16x256xf32>
    %1 = vector.shape_cast %0 : vector<1x16x256xf32> to vector<16x256xf32>
    %cst = arith.constant 0.000000e+00 : bf16
    %2 = vector.broadcast %cst : bf16 to vector<48x17xbf16>
    %c0_2 = arith.constant 0 : index
    %c111 = arith.constant 111 : index
    %3 = vector.load %arg7[%c0_2, %c111] : memref<48x512xbf16, #tpu.memory_space<vmem>>, vector<48x17xbf16>
    tpu.vector_store %arg7[%c0_2, %c111], %2 {strides = array<i32>} : memref<48x512xbf16, #tpu.memory_space<vmem>>, vector<48x17xbf16>,
    %c0_3 = arith.constant 0 : index
    %c384 = arith.constant 384 : index
    %4 = vector.load %arg7[%c0_3, %c384] : memref<48x512xbf16, #tpu.memory_space<vmem>>, vector<48x17xbf16>
    tpu.vector_store %arg7[%c0_3, %c384], %2 {strides = array<i32>} : memref<48x512xbf16, #tpu.memory_space<vmem>>, vector<48x17xbf16>,
    %5 = arith.truncf %1 : vector<16x256xf32> to vector<16x256xbf16>
    %c0_4 = arith.constant 0 : index
    %c128 = arith.constant 128 : index
    %6 = vector.load %arg7[%c0_4, %c128] : memref<48x512xbf16, #tpu.memory_space<vmem>>, vector<16x256xbf16>
    tpu.vector_store %arg7[%c0_4, %c128], %5 {strides = array<i32>} : memref<48x512xbf16, #tpu.memory_space<vmem>>, vector<16x256xbf16>,
    %c0_5 = arith.constant 0 : index
    %c0_6 = arith.constant 0 : index
    %7 = vector.load %arg3[%c0_5, %c0_6] : memref<1x256xf32, #tpu.memory_space<vmem>>, vector<1x256xf32>
    %8 = vector.broadcast %7 : vector<1x256xf32> to vector<16x256xf32>
    %9 = arith.mulf %1, %8 : vector<16x256xf32>
    %10 = arith.truncf %9 : vector<16x256xf32> to vector<16x256xbf16>
    %c16 = arith.constant 16 : index
    %c128_7 = arith.constant 128 : index
    %11 = vector.load %arg7[%c16, %c128_7] : memref<48x512xbf16, #tpu.memory_space<vmem>>, vector<16x256xbf16>
    tpu.vector_store %arg7[%c16, %c128_7], %10 {strides = array<i32>} : memref<48x512xbf16, #tpu.memory_space<vmem>>, vector<16x256xbf16>,
    %c0_8 = arith.constant 0 : index
    %c0_9 = arith.constant 0 : index
    %12 = vector.load %arg4[%c0_8, %c0_9] : memref<1x256xf32, #tpu.memory_space<vmem>>, vector<1x256xf32>
    %13 = vector.broadcast %12 : vector<1x256xf32> to vector<16x256xf32>
    %14 = arith.mulf %1, %13 : vector<16x256xf32>
    %15 = arith.truncf %14 : vector<16x256xf32> to vector<16x256xbf16>
    %c32 = arith.constant 32 : index
    %c128_10 = arith.constant 128 : index
    %16 = vector.load %arg7[%c32, %c128_10] : memref<48x512xbf16, #tpu.memory_space<vmem>>, vector<16x256xbf16>
    tpu.vector_store %arg7[%c32, %c128_10], %15 {strides = array<i32>} : memref<48x512xbf16, #tpu.memory_space<vmem>>, vector<16x256xbf16>,
    %c16_11 = arith.constant 16 : index
    %c111_12 = arith.constant 111 : index
    %17 = vector.load %arg7[%c16_11, %c111_12] : memref<48x512xbf16, #tpu.memory_space<vmem>>, vector<16x256xbf16>
    %c0_13 = arith.constant 0 : index
    %c0_14 = arith.constant 0 : index
    %18 = vector.load %arg8[%c0_13, %c0_14] : memref<144x256xbf16, #tpu.memory_space<vmem>>, vector<16x256xbf16>
    tpu.vector_store %arg8[%c0_13, %c0_14], %17 {strides = array<i32>} : memref<144x256xbf16, #tpu.memory_space<vmem>>, vector<16x256xbf16>,
    %c0_15 = arith.constant 0 : index
    %c112 = arith.constant 112 : index
    %19 = vector.load %arg7[%c0_15, %c112] : memref<48x512xbf16, #tpu.memory_space<vmem>>, vector<16x256xbf16>
    %c16_16 = arith.constant 16 : index
    %c0_17 = arith.constant 0 : index
    %20 = vector.load %arg8[%c16_16, %c0_17] : memref<144x256xbf16, #tpu.memory_space<vmem>>, vector<16x256xbf16>
    tpu.vector_store %arg8[%c16_16, %c0_17], %19 {strides = array<i32>} : memref<144x256xbf16, #tpu.memory_space<vmem>>, vector<16x256xbf16>,
    %c32_18 = arith.constant 32 : index
    %c113 = arith.constant 113 : index
    %21 = vector.load %arg7[%c32_18, %c113] : memref<48x512xbf16, #tpu.memory_space<vmem>>, vector<16x256xbf16>
    %c32_19 = arith.constant 32 : index
    %c0_20 = arith.constant 0 : index
    %22 = vector.load %arg8[%c32_19, %c0_20] : memref<144x256xbf16, #tpu.memory_space<vmem>>, vector<16x256xbf16>
    tpu.vector_store %arg8[%c32_19, %c0_20], %21 {strides = array<i32>} : memref<144x256xbf16, #tpu.memory_space<vmem>>, vector<16x256xbf16>,
    %c16_21 = arith.constant 16 : index
    %c127 = arith.constant 127 : index
    %23 = vector.load %arg7[%c16_21, %c127] : memref<48x512xbf16, #tpu.memory_space<vmem>>, vector<16x256xbf16>
    %c48 = arith.constant 48 : index
    %c0_22 = arith.constant 0 : index
    %24 = vector.load %arg8[%c48, %c0_22] : memref<144x256xbf16, #tpu.memory_space<vmem>>, vector<16x256xbf16>
    tpu.vector_store %arg8[%c48, %c0_22], %23 {strides = array<i32>} : memref<144x256xbf16, #tpu.memory_space<vmem>>, vector<16x256xbf16>,
    %c0_23 = arith.constant 0 : index
    %c128_24 = arith.constant 128 : index
    %25 = vector.load %arg7[%c0_23, %c128_24] : memref<48x512xbf16, #tpu.memory_space<vmem>>, vector<16x256xbf16>
    %c64 = arith.constant 64 : index
    %c0_25 = arith.constant 0 : index
    %26 = vector.load %arg8[%c64, %c0_25] : memref<144x256xbf16, #tpu.memory_space<vmem>>, vector<16x256xbf16>
    tpu.vector_store %arg8[%c64, %c0_25], %25 {strides = array<i32>} : memref<144x256xbf16, #tpu.memory_space<vmem>>, vector<16x256xbf16>,
    %c32_26 = arith.constant 32 : index
    %c129 = arith.constant 129 : index
    %27 = vector.load %arg7[%c32_26, %c129] : memref<48x512xbf16, #tpu.memory_space<vmem>>, vector<16x256xbf16>
    %c80 = arith.constant 80 : index
    %c0_27 = arith.constant 0 : index
    %28 = vector.load %arg8[%c80, %c0_27] : memref<144x256xbf16, #tpu.memory_space<vmem>>, vector<16x256xbf16>
    tpu.vector_store %arg8[%c80, %c0_27], %27 {strides = array<i32>} : memref<144x256xbf16, #tpu.memory_space<vmem>>, vector<16x256xbf16>,
    %c16_28 = arith.constant 16 : index
    %c143 = arith.constant 143 : index
    %29 = vector.load %arg7[%c16_28, %c143] : memref<48x512xbf16, #tpu.memory_space<vmem>>, vector<16x256xbf16>
    %c96 = arith.constant 96 : index
    %c0_29 = arith.constant 0 : index
    %30 = vector.load %arg8[%c96, %c0_29] : memref<144x256xbf16, #tpu.memory_space<vmem>>, vector<16x256xbf16>
    tpu.vector_store %arg8[%c96, %c0_29], %29 {strides = array<i32>} : memref<144x256xbf16, #tpu.memory_space<vmem>>, vector<16x256xbf16>,
    %c0_30 = arith.constant 0 : index
    %c144 = arith.constant 144 : index
    %31 = vector.load %arg7[%c0_30, %c144] : memref<48x512xbf16, #tpu.memory_space<vmem>>, vector<16x256xbf16>
    %c112_31 = arith.constant 112 : index
    %c0_32 = arith.constant 0 : index
    %32 = vector.load %arg8[%c112_31, %c0_32] : memref<144x256xbf16, #tpu.memory_space<vmem>>, vector<16x256xbf16>
    tpu.vector_store %arg8[%c112_31, %c0_32], %31 {strides = array<i32>} : memref<144x256xbf16, #tpu.memory_space<vmem>>, vector<16x256xbf16>,
    %c32_33 = arith.constant 32 : index
    %c145 = arith.constant 145 : index
    %33 = vector.load %arg7[%c32_33, %c145] : memref<48x512xbf16, #tpu.memory_space<vmem>>, vector<16x256xbf16>
    %c128_34 = arith.constant 128 : index
    %c0_35 = arith.constant 0 : index
    %34 = vector.load %arg8[%c128_34, %c0_35] : memref<144x256xbf16, #tpu.memory_space<vmem>>, vector<16x256xbf16>
    tpu.vector_store %arg8[%c128_34, %c0_35], %33 {strides = array<i32>} : memref<144x256xbf16, #tpu.memory_space<vmem>>, vector<16x256xbf16>,
    %c0_36 = arith.constant 0 : index
    %c0_37 = arith.constant 0 : index
    %35 = vector.load %arg2[%c0_36, %c0_37] : memref<16x144xbf16, #tpu.memory_space<vmem>>, vector<16x144xbf16>
    %c0_38 = arith.constant 0 : index
    %c0_39 = arith.constant 0 : index
    %36 = vector.load %arg8[%c0_38, %c0_39] : memref<144x256xbf16, #tpu.memory_space<vmem>>, vector<144x256xbf16>
    %cst_40 = arith.constant dense<0.000000e+00> : vector<16x256xf32>
    %37 = tpu.matmul %35, %36, %cst_40 {dimension_numbers = #tpu.dot_dimension_numbers<[1], [0], [0], [1], [0, 0, 1, 1], [], []>} : vector<16x144xbf16>, vector<144x256xbf16>, vector<16x256xf32> -> vector<16x256xf32>
    %38 = arith.truncf %37 : vector<16x256xf32> to vector<16x256xbf16>
    %c0_41 = arith.constant 0 : index
    %c0_42 = arith.constant 0 : index
    %c0_43 = arith.constant 0 : index
    %39 = vector.load %arg5[%c0_41, %c0_42, %c0_43] : memref<1x16x256xbf16, #tpu.memory_space<vmem>>, vector<1x16x256xbf16>
    %40 = vector.shape_cast %39 : vector<1x16x256xbf16> to vector<16x256xbf16>
    %41 = vector.shape_cast %38 : vector<16x256xbf16> to vector<1x16x256xbf16>
    tpu.vector_store %arg5[%c0_41, %c0_42, %c0_43], %41 {strides = array<i32>} : memref<1x16x256xbf16, #tpu.memory_space<vmem>>, vector<1x16x256xbf16>,
    %cst_44 = arith.constant dense<0.000000e+00> : vector<16xf32>
    %42 = vector.multi_reduction <add>, %37, %cst_44 [1] : vector<16x256xf32> to vector<16xf32>
    %43 = vector.shape_cast %42 : vector<16xf32> to vector<16x1xf32>
    %c0_45 = arith.constant 0 : index
    %c0_46 = arith.constant 0 : index
    %c0_47 = arith.constant 0 : index
    %44 = vector.load %arg6[%c0_45, %c0_46, %c0_47] : memref<1x16x2xf32, #tpu.memory_space<vmem>>, vector<1x16x1xf32>
    %45 = vector.shape_cast %44 : vector<1x16x1xf32> to vector<16x1xf32>
    %46 = vector.shape_cast %43 : vector<16x1xf32> to vector<1x16x1xf32>
    tpu.vector_store %arg6[%c0_45, %c0_46, %c0_47], %46 {strides = array<i32>} : memref<1x16x2xf32, #tpu.memory_space<vmem>>, vector<1x16x1xf32>,
    %47 = arith.mulf %37, %37 : vector<16x256xf32>
    %cst_48 = arith.constant dense<0.000000e+00> : vector<16xf32>
    %48 = vector.multi_reduction <add>, %47, %cst_48 [1] : vector<16x256xf32> to vector<16xf32>
    %49 = vector.shape_cast %48 : vector<16xf32> to vector<16x1xf32>
    %c0_49 = arith.constant 0 : index
    %c0_50 = arith.constant 0 : index
    %c1 = arith.constant 1 : index
    %50 = vector.load %arg6[%c0_49, %c0_50, %c1] : memref<1x16x2xf32, #tpu.memory_space<vmem>>, vector<1x16x1xf32>
    %51 = vector.shape_cast %50 : vector<1x16x1xf32> to vector<16x1xf32>
    %52 = vector.shape_cast %49 : vector<16x1xf32> to vector<1x16x1xf32>
    tpu.vector_store %arg6[%c0_49, %c0_50, %c1], %52 {strides = array<i32>} : memref<1x16x2xf32, #tpu.memory_space<vmem>>, vector<1x16x1xf32>,
    return
  }
  func.func @transform_0(%arg0: i32) -> (i32, i32, i32) {
    %c0_i32 = arith.constant 0 : i32
    %c0_i32_0 = arith.constant 0 : i32
    %c0_i32_1 = arith.constant 0 : i32
    return %arg0, %c0_i32, %c0_i32_0 : i32, i32, i32
  }
  func.func @transform_1(%arg0: i32) -> (i32, i32) {
    %c0_i32 = arith.constant 0 : i32
    %c0_i32_0 = arith.constant 0 : i32
    %c0_i32_1 = arith.constant 0 : i32
    return %c0_i32, %c0_i32_0 : i32, i32
  }
  func.func @transform_2(%arg0: i32) -> (i32, i32) {
    %c0_i32 = arith.constant 0 : i32
    %c0_i32_0 = arith.constant 0 : i32
    %c0_i32_1 = arith.constant 0 : i32
    return %c0_i32, %c0_i32_0 : i32, i32
  }
  func.func @transform_3(%arg0: i32) -> (i32, i32) {
    %c0_i32 = arith.constant 0 : i32
    %c0_i32_0 = arith.constant 0 : i32
    %c0_i32_1 = arith.constant 0 : i32
    return %c0_i32, %c0_i32_0 : i32, i32
  }
  func.func @transform_4(%arg0: i32) -> (i32, i32, i32) {
    %c0_i32 = arith.constant 0 : i32
    %c0_i32_0 = arith.constant 0 : i32
    %c0_i32_1 = arith.constant 0 : i32
    return %arg0, %c0_i32, %c0_i32_0 : i32, i32, i32
  }
  func.func @transform_5(%arg0: i32) -> (i32, i32, i32) {
    %c0_i32 = arith.constant 0 : i32
    %c0_i32_0 = arith.constant 0 : i32
    %c0_i32_1 = arith.constant 0 : i32
    return %arg0, %c0_i32, %c0_i32_0 : i32, i32, i32
  }
}

module attributes {stable_mosaic.version = 11 : i64} {
  func.func @_bn_relu_kernel(%arg0: i32, %arg1: memref<1x16x256xf32, #tpu.memory_space<vmem>>, %arg2: memref<16x1xf32, #tpu.memory_space<vmem>>, %arg3: memref<16x1xf32, #tpu.memory_space<vmem>>, %arg4: memref<1x16x256xf32, #tpu.memory_space<vmem>>) attributes {dimension_semantics = [#tpu.dimension_semantics<parallel>], iteration_bounds = array<i64: 2>, scalar_prefetch = 0 : i64, scratch_operands = 0 : i64, tpu.core_type = #tpu.core_type<tc>, window_params = [{transform_indices = @transform_0, window_bounds = array<i64: 1, 16, 256>}, {pipeline_mode = #tpu.pipeline_mode<synchronous>, transform_indices = @transform_1, window_bounds = array<i64: 16, 1>}, {pipeline_mode = #tpu.pipeline_mode<synchronous>, transform_indices = @transform_2, window_bounds = array<i64: 16, 1>}, {transform_indices = @transform_3, window_bounds = array<i64: 1, 16, 256>}]} {
    %c0 = arith.constant 0 : index
    %c0_0 = arith.constant 0 : index
    %c0_1 = arith.constant 0 : index
    %0 = vector.load %arg1[%c0, %c0_0, %c0_1] : memref<1x16x256xf32, #tpu.memory_space<vmem>>, vector<1x16x256xf32>
    %1 = vector.shape_cast %0 : vector<1x16x256xf32> to vector<16x256xf32>
    %c0_2 = arith.constant 0 : index
    %c0_3 = arith.constant 0 : index
    %2 = vector.load %arg2[%c0_2, %c0_3] : memref<16x1xf32, #tpu.memory_space<vmem>>, vector<16x1xf32>
    %3 = vector.broadcast %2 : vector<16x1xf32> to vector<16x256xf32>
    %4 = arith.mulf %1, %3 : vector<16x256xf32>
    %c0_4 = arith.constant 0 : index
    %c0_5 = arith.constant 0 : index
    %5 = vector.load %arg3[%c0_4, %c0_5] : memref<16x1xf32, #tpu.memory_space<vmem>>, vector<16x1xf32>
    %6 = vector.broadcast %5 : vector<16x1xf32> to vector<16x256xf32>
    %7 = arith.addf %4, %6 : vector<16x256xf32>
    %cst = arith.constant 0.000000e+00 : f32
    %8 = vector.broadcast %cst : f32 to vector<16x256xf32>
    %9 = arith.maximumf %7, %8 : vector<16x256xf32>
    %c0_6 = arith.constant 0 : index
    %c0_7 = arith.constant 0 : index
    %c0_8 = arith.constant 0 : index
    %10 = vector.load %arg4[%c0_6, %c0_7, %c0_8] : memref<1x16x256xf32, #tpu.memory_space<vmem>>, vector<1x16x256xf32>
    %11 = vector.shape_cast %10 : vector<1x16x256xf32> to vector<16x256xf32>
    %12 = vector.shape_cast %9 : vector<16x256xf32> to vector<1x16x256xf32>
    tpu.vector_store %arg4[%c0_6, %c0_7, %c0_8], %12 {strides = array<i32>} : memref<1x16x256xf32, #tpu.memory_space<vmem>>, vector<1x16x256xf32>,
    return
  }
  func.func @transform_0(%arg0: i32) -> (i32, i32, i32) {
    %c0_i32 = arith.constant 0 : i32
    %c0_i32_0 = arith.constant 0 : i32
    %c0_i32_1 = arith.constant 0 : i32
    return %arg0, %c0_i32, %c0_i32_0 : i32, i32, i32
  }
  func.func @transform_1(%arg0: i32) -> (i32, i32) {
    %c0_i32 = arith.constant 0 : i32
    %c0_i32_0 = arith.constant 0 : i32
    %c0_i32_1 = arith.constant 0 : i32
    return %c0_i32, %c0_i32_0 : i32, i32
  }
  func.func @transform_2(%arg0: i32) -> (i32, i32) {
    %c0_i32 = arith.constant 0 : i32
    %c0_i32_0 = arith.constant 0 : i32
    %c0_i32_1 = arith.constant 0 : i32
    return %c0_i32, %c0_i32_0 : i32, i32
  }
  func.func @transform_3(%arg0: i32) -> (i32, i32, i32) {
    %c0_i32 = arith.constant 0 : i32
    %c0_i32_0 = arith.constant 0 : i32
    %c0_i32_1 = arith.constant 0 : i32
    return %arg0, %c0_i32, %c0_i32_0 : i32, i32, i32
  }
}

module attributes {stable_mosaic.version = 11 : i64} {
  func.func @_conv3x3_bnstat_kernel(%arg0: i32, %arg1: memref<1x16x256xbf16, #tpu.memory_space<vmem>>, %arg2: memref<16x144xbf16, #tpu.memory_space<vmem>>, %arg3: memref<16x1xf32, #tpu.memory_space<vmem>>, %arg4: memref<16x1xf32, #tpu.memory_space<vmem>>, %arg5: memref<1x256xf32, #tpu.memory_space<vmem>>, %arg6: memref<1x256xf32, #tpu.memory_space<vmem>>, %arg7: memref<1x16x256xf32, #tpu.memory_space<vmem>>, %arg8: memref<1x16x2xf32, #tpu.memory_space<vmem>>, %arg9: memref<48x512xbf16, #tpu.memory_space<vmem>>, %arg10: memref<144x256xbf16, #tpu.memory_space<vmem>>) attributes {dimension_semantics = [#tpu.dimension_semantics<parallel>], iteration_bounds = array<i64: 2>, scalar_prefetch = 0 : i64, scratch_operands = 2 : i64, tpu.core_type = #tpu.core_type<tc>, window_params = [{transform_indices = @transform_0, window_bounds = array<i64: 1, 16, 256>}, {pipeline_mode = #tpu.pipeline_mode<synchronous>, transform_indices = @transform_1, window_bounds = array<i64: 16, 144>}, {pipeline_mode = #tpu.pipeline_mode<synchronous>, transform_indices = @transform_2, window_bounds = array<i64: 16, 1>}, {pipeline_mode = #tpu.pipeline_mode<synchronous>, transform_indices = @transform_3, window_bounds = array<i64: 16, 1>}, {pipeline_mode = #tpu.pipeline_mode<synchronous>, transform_indices = @transform_4, window_bounds = array<i64: 1, 256>}, {pipeline_mode = #tpu.pipeline_mode<synchronous>, transform_indices = @transform_5, window_bounds = array<i64: 1, 256>}, {transform_indices = @transform_6, window_bounds = array<i64: 1, 16, 256>}, {transform_indices = @transform_7, window_bounds = array<i64: 1, 16, 2>}]} {
    %c0 = arith.constant 0 : index
    %c0_0 = arith.constant 0 : index
    %c0_1 = arith.constant 0 : index
    %0 = vector.load %arg1[%c0, %c0_0, %c0_1] : memref<1x16x256xbf16, #tpu.memory_space<vmem>>, vector<1x16x256xbf16>
    %1 = vector.shape_cast %0 : vector<1x16x256xbf16> to vector<16x256xbf16>
    %2 = arith.extf %1 : vector<16x256xbf16> to vector<16x256xf32>
    %c0_2 = arith.constant 0 : index
    %c0_3 = arith.constant 0 : index
    %3 = vector.load %arg3[%c0_2, %c0_3] : memref<16x1xf32, #tpu.memory_space<vmem>>, vector<16x1xf32>
    %4 = vector.broadcast %3 : vector<16x1xf32> to vector<16x256xf32>
    %5 = arith.mulf %2, %4 : vector<16x256xf32>
    %c0_4 = arith.constant 0 : index
    %c0_5 = arith.constant 0 : index
    %6 = vector.load %arg4[%c0_4, %c0_5] : memref<16x1xf32, #tpu.memory_space<vmem>>, vector<16x1xf32>
    %7 = vector.broadcast %6 : vector<16x1xf32> to vector<16x256xf32>
    %8 = arith.addf %5, %7 : vector<16x256xf32>
    %cst = arith.constant 0.000000e+00 : f32
    %9 = vector.broadcast %cst : f32 to vector<16x256xf32>
    %10 = arith.maximumf %8, %9 : vector<16x256xf32>
    %cst_6 = arith.constant 0.000000e+00 : bf16
    %11 = vector.broadcast %cst_6 : bf16 to vector<48x17xbf16>
    %c0_7 = arith.constant 0 : index
    %c111 = arith.constant 111 : index
    %12 = vector.load %arg9[%c0_7, %c111] : memref<48x512xbf16, #tpu.memory_space<vmem>>, vector<48x17xbf16>
    tpu.vector_store %arg9[%c0_7, %c111], %11 {strides = array<i32>} : memref<48x512xbf16, #tpu.memory_space<vmem>>, vector<48x17xbf16>,
    %c0_8 = arith.constant 0 : index
    %c384 = arith.constant 384 : index
    %13 = vector.load %arg9[%c0_8, %c384] : memref<48x512xbf16, #tpu.memory_space<vmem>>, vector<48x17xbf16>
    tpu.vector_store %arg9[%c0_8, %c384], %11 {strides = array<i32>} : memref<48x512xbf16, #tpu.memory_space<vmem>>, vector<48x17xbf16>,
    %14 = arith.truncf %10 : vector<16x256xf32> to vector<16x256xbf16>
    %c0_9 = arith.constant 0 : index
    %c128 = arith.constant 128 : index
    %15 = vector.load %arg9[%c0_9, %c128] : memref<48x512xbf16, #tpu.memory_space<vmem>>, vector<16x256xbf16>
    tpu.vector_store %arg9[%c0_9, %c128], %14 {strides = array<i32>} : memref<48x512xbf16, #tpu.memory_space<vmem>>, vector<16x256xbf16>,
    %c0_10 = arith.constant 0 : index
    %c0_11 = arith.constant 0 : index
    %16 = vector.load %arg5[%c0_10, %c0_11] : memref<1x256xf32, #tpu.memory_space<vmem>>, vector<1x256xf32>
    %17 = vector.broadcast %16 : vector<1x256xf32> to vector<16x256xf32>
    %18 = arith.mulf %10, %17 : vector<16x256xf32>
    %19 = arith.truncf %18 : vector<16x256xf32> to vector<16x256xbf16>
    %c16 = arith.constant 16 : index
    %c128_12 = arith.constant 128 : index
    %20 = vector.load %arg9[%c16, %c128_12] : memref<48x512xbf16, #tpu.memory_space<vmem>>, vector<16x256xbf16>
    tpu.vector_store %arg9[%c16, %c128_12], %19 {strides = array<i32>} : memref<48x512xbf16, #tpu.memory_space<vmem>>, vector<16x256xbf16>,
    %c0_13 = arith.constant 0 : index
    %c0_14 = arith.constant 0 : index
    %21 = vector.load %arg6[%c0_13, %c0_14] : memref<1x256xf32, #tpu.memory_space<vmem>>, vector<1x256xf32>
    %22 = vector.broadcast %21 : vector<1x256xf32> to vector<16x256xf32>
    %23 = arith.mulf %10, %22 : vector<16x256xf32>
    %24 = arith.truncf %23 : vector<16x256xf32> to vector<16x256xbf16>
    %c32 = arith.constant 32 : index
    %c128_15 = arith.constant 128 : index
    %25 = vector.load %arg9[%c32, %c128_15] : memref<48x512xbf16, #tpu.memory_space<vmem>>, vector<16x256xbf16>
    tpu.vector_store %arg9[%c32, %c128_15], %24 {strides = array<i32>} : memref<48x512xbf16, #tpu.memory_space<vmem>>, vector<16x256xbf16>,
    %c16_16 = arith.constant 16 : index
    %c111_17 = arith.constant 111 : index
    %26 = vector.load %arg9[%c16_16, %c111_17] : memref<48x512xbf16, #tpu.memory_space<vmem>>, vector<16x256xbf16>
    %c0_18 = arith.constant 0 : index
    %c0_19 = arith.constant 0 : index
    %27 = vector.load %arg10[%c0_18, %c0_19] : memref<144x256xbf16, #tpu.memory_space<vmem>>, vector<16x256xbf16>
    tpu.vector_store %arg10[%c0_18, %c0_19], %26 {strides = array<i32>} : memref<144x256xbf16, #tpu.memory_space<vmem>>, vector<16x256xbf16>,
    %c0_20 = arith.constant 0 : index
    %c112 = arith.constant 112 : index
    %28 = vector.load %arg9[%c0_20, %c112] : memref<48x512xbf16, #tpu.memory_space<vmem>>, vector<16x256xbf16>
    %c16_21 = arith.constant 16 : index
    %c0_22 = arith.constant 0 : index
    %29 = vector.load %arg10[%c16_21, %c0_22] : memref<144x256xbf16, #tpu.memory_space<vmem>>, vector<16x256xbf16>
    tpu.vector_store %arg10[%c16_21, %c0_22], %28 {strides = array<i32>} : memref<144x256xbf16, #tpu.memory_space<vmem>>, vector<16x256xbf16>,
    %c32_23 = arith.constant 32 : index
    %c113 = arith.constant 113 : index
    %30 = vector.load %arg9[%c32_23, %c113] : memref<48x512xbf16, #tpu.memory_space<vmem>>, vector<16x256xbf16>
    %c32_24 = arith.constant 32 : index
    %c0_25 = arith.constant 0 : index
    %31 = vector.load %arg10[%c32_24, %c0_25] : memref<144x256xbf16, #tpu.memory_space<vmem>>, vector<16x256xbf16>
    tpu.vector_store %arg10[%c32_24, %c0_25], %30 {strides = array<i32>} : memref<144x256xbf16, #tpu.memory_space<vmem>>, vector<16x256xbf16>,
    %c16_26 = arith.constant 16 : index
    %c127 = arith.constant 127 : index
    %32 = vector.load %arg9[%c16_26, %c127] : memref<48x512xbf16, #tpu.memory_space<vmem>>, vector<16x256xbf16>
    %c48 = arith.constant 48 : index
    %c0_27 = arith.constant 0 : index
    %33 = vector.load %arg10[%c48, %c0_27] : memref<144x256xbf16, #tpu.memory_space<vmem>>, vector<16x256xbf16>
    tpu.vector_store %arg10[%c48, %c0_27], %32 {strides = array<i32>} : memref<144x256xbf16, #tpu.memory_space<vmem>>, vector<16x256xbf16>,
    %c0_28 = arith.constant 0 : index
    %c128_29 = arith.constant 128 : index
    %34 = vector.load %arg9[%c0_28, %c128_29] : memref<48x512xbf16, #tpu.memory_space<vmem>>, vector<16x256xbf16>
    %c64 = arith.constant 64 : index
    %c0_30 = arith.constant 0 : index
    %35 = vector.load %arg10[%c64, %c0_30] : memref<144x256xbf16, #tpu.memory_space<vmem>>, vector<16x256xbf16>
    tpu.vector_store %arg10[%c64, %c0_30], %34 {strides = array<i32>} : memref<144x256xbf16, #tpu.memory_space<vmem>>, vector<16x256xbf16>,
    %c32_31 = arith.constant 32 : index
    %c129 = arith.constant 129 : index
    %36 = vector.load %arg9[%c32_31, %c129] : memref<48x512xbf16, #tpu.memory_space<vmem>>, vector<16x256xbf16>
    %c80 = arith.constant 80 : index
    %c0_32 = arith.constant 0 : index
    %37 = vector.load %arg10[%c80, %c0_32] : memref<144x256xbf16, #tpu.memory_space<vmem>>, vector<16x256xbf16>
    tpu.vector_store %arg10[%c80, %c0_32], %36 {strides = array<i32>} : memref<144x256xbf16, #tpu.memory_space<vmem>>, vector<16x256xbf16>,
    %c16_33 = arith.constant 16 : index
    %c143 = arith.constant 143 : index
    %38 = vector.load %arg9[%c16_33, %c143] : memref<48x512xbf16, #tpu.memory_space<vmem>>, vector<16x256xbf16>
    %c96 = arith.constant 96 : index
    %c0_34 = arith.constant 0 : index
    %39 = vector.load %arg10[%c96, %c0_34] : memref<144x256xbf16, #tpu.memory_space<vmem>>, vector<16x256xbf16>
    tpu.vector_store %arg10[%c96, %c0_34], %38 {strides = array<i32>} : memref<144x256xbf16, #tpu.memory_space<vmem>>, vector<16x256xbf16>,
    %c0_35 = arith.constant 0 : index
    %c144 = arith.constant 144 : index
    %40 = vector.load %arg9[%c0_35, %c144] : memref<48x512xbf16, #tpu.memory_space<vmem>>, vector<16x256xbf16>
    %c112_36 = arith.constant 112 : index
    %c0_37 = arith.constant 0 : index
    %41 = vector.load %arg10[%c112_36, %c0_37] : memref<144x256xbf16, #tpu.memory_space<vmem>>, vector<16x256xbf16>
    tpu.vector_store %arg10[%c112_36, %c0_37], %40 {strides = array<i32>} : memref<144x256xbf16, #tpu.memory_space<vmem>>, vector<16x256xbf16>,
    %c32_38 = arith.constant 32 : index
    %c145 = arith.constant 145 : index
    %42 = vector.load %arg9[%c32_38, %c145] : memref<48x512xbf16, #tpu.memory_space<vmem>>, vector<16x256xbf16>
    %c128_39 = arith.constant 128 : index
    %c0_40 = arith.constant 0 : index
    %43 = vector.load %arg10[%c128_39, %c0_40] : memref<144x256xbf16, #tpu.memory_space<vmem>>, vector<16x256xbf16>
    tpu.vector_store %arg10[%c128_39, %c0_40], %42 {strides = array<i32>} : memref<144x256xbf16, #tpu.memory_space<vmem>>, vector<16x256xbf16>,
    %c0_41 = arith.constant 0 : index
    %c0_42 = arith.constant 0 : index
    %44 = vector.load %arg2[%c0_41, %c0_42] : memref<16x144xbf16, #tpu.memory_space<vmem>>, vector<16x144xbf16>
    %c0_43 = arith.constant 0 : index
    %c0_44 = arith.constant 0 : index
    %45 = vector.load %arg10[%c0_43, %c0_44] : memref<144x256xbf16, #tpu.memory_space<vmem>>, vector<144x256xbf16>
    %cst_45 = arith.constant dense<0.000000e+00> : vector<16x256xf32>
    %46 = tpu.matmul %44, %45, %cst_45 {dimension_numbers = #tpu.dot_dimension_numbers<[1], [0], [0], [1], [0, 0, 1, 1], [], []>} : vector<16x144xbf16>, vector<144x256xbf16>, vector<16x256xf32> -> vector<16x256xf32>
    %c0_46 = arith.constant 0 : index
    %c0_47 = arith.constant 0 : index
    %c0_48 = arith.constant 0 : index
    %47 = vector.load %arg7[%c0_46, %c0_47, %c0_48] : memref<1x16x256xf32, #tpu.memory_space<vmem>>, vector<1x16x256xf32>
    %48 = vector.shape_cast %47 : vector<1x16x256xf32> to vector<16x256xf32>
    %49 = vector.shape_cast %46 : vector<16x256xf32> to vector<1x16x256xf32>
    tpu.vector_store %arg7[%c0_46, %c0_47, %c0_48], %49 {strides = array<i32>} : memref<1x16x256xf32, #tpu.memory_space<vmem>>, vector<1x16x256xf32>,
    %cst_49 = arith.constant dense<0.000000e+00> : vector<16xf32>
    %50 = vector.multi_reduction <add>, %46, %cst_49 [1] : vector<16x256xf32> to vector<16xf32>
    %51 = vector.shape_cast %50 : vector<16xf32> to vector<16x1xf32>
    %c0_50 = arith.constant 0 : index
    %c0_51 = arith.constant 0 : index
    %c0_52 = arith.constant 0 : index
    %52 = vector.load %arg8[%c0_50, %c0_51, %c0_52] : memref<1x16x2xf32, #tpu.memory_space<vmem>>, vector<1x16x1xf32>
    %53 = vector.shape_cast %52 : vector<1x16x1xf32> to vector<16x1xf32>
    %54 = vector.shape_cast %51 : vector<16x1xf32> to vector<1x16x1xf32>
    tpu.vector_store %arg8[%c0_50, %c0_51, %c0_52], %54 {strides = array<i32>} : memref<1x16x2xf32, #tpu.memory_space<vmem>>, vector<1x16x1xf32>,
    %55 = arith.mulf %46, %46 : vector<16x256xf32>
    %cst_53 = arith.constant dense<0.000000e+00> : vector<16xf32>
    %56 = vector.multi_reduction <add>, %55, %cst_53 [1] : vector<16x256xf32> to vector<16xf32>
    %57 = vector.shape_cast %56 : vector<16xf32> to vector<16x1xf32>
    %c0_54 = arith.constant 0 : index
    %c0_55 = arith.constant 0 : index
    %c1 = arith.constant 1 : index
    %58 = vector.load %arg8[%c0_54, %c0_55, %c1] : memref<1x16x2xf32, #tpu.memory_space<vmem>>, vector<1x16x1xf32>
    %59 = vector.shape_cast %58 : vector<1x16x1xf32> to vector<16x1xf32>
    %60 = vector.shape_cast %57 : vector<16x1xf32> to vector<1x16x1xf32>
    tpu.vector_store %arg8[%c0_54, %c0_55, %c1], %60 {strides = array<i32>} : memref<1x16x2xf32, #tpu.memory_space<vmem>>, vector<1x16x1xf32>,
    return
  }
  func.func @transform_0(%arg0: i32) -> (i32, i32, i32) {
    %c0_i32 = arith.constant 0 : i32
    %c0_i32_0 = arith.constant 0 : i32
    %c0_i32_1 = arith.constant 0 : i32
    return %arg0, %c0_i32, %c0_i32_0 : i32, i32, i32
  }
  func.func @transform_1(%arg0: i32) -> (i32, i32) {
    %c0_i32 = arith.constant 0 : i32
    %c0_i32_0 = arith.constant 0 : i32
    %c0_i32_1 = arith.constant 0 : i32
    return %c0_i32, %c0_i32_0 : i32, i32
  }
  func.func @transform_2(%arg0: i32) -> (i32, i32) {
    %c0_i32 = arith.constant 0 : i32
    %c0_i32_0 = arith.constant 0 : i32
    %c0_i32_1 = arith.constant 0 : i32
    return %c0_i32, %c0_i32_0 : i32, i32
  }
  func.func @transform_3(%arg0: i32) -> (i32, i32) {
    %c0_i32 = arith.constant 0 : i32
    %c0_i32_0 = arith.constant 0 : i32
    %c0_i32_1 = arith.constant 0 : i32
    return %c0_i32, %c0_i32_0 : i32, i32
  }
  func.func @transform_4(%arg0: i32) -> (i32, i32) {
    %c0_i32 = arith.constant 0 : i32
    %c0_i32_0 = arith.constant 0 : i32
    %c0_i32_1 = arith.constant 0 : i32
    return %c0_i32, %c0_i32_0 : i32, i32
  }
  func.func @transform_5(%arg0: i32) -> (i32, i32) {
    %c0_i32 = arith.constant 0 : i32
    %c0_i32_0 = arith.constant 0 : i32
    %c0_i32_1 = arith.constant 0 : i32
    return %c0_i32, %c0_i32_0 : i32, i32
  }
  func.func @transform_6(%arg0: i32) -> (i32, i32, i32) {
    %c0_i32 = arith.constant 0 : i32
    %c0_i32_0 = arith.constant 0 : i32
    %c0_i32_1 = arith.constant 0 : i32
    return %arg0, %c0_i32, %c0_i32_0 : i32, i32, i32
  }
  func.func @transform_7(%arg0: i32) -> (i32, i32, i32) {
    %c0_i32 = arith.constant 0 : i32
    %c0_i32_0 = arith.constant 0 : i32
    %c0_i32_1 = arith.constant 0 : i32
    return %arg0, %c0_i32, %c0_i32_0 : i32, i32, i32
  }
}

</mosaic_0001>

<bundles_post_ra>
// kernel: double_conv_forward.5
= control target key start
LH: loop header
LB: loop body
LE: loop exit
PB: predicated region body
PF: predicated region fallthrough
CT: control target
= control target key end

     0   :  { %s323_s12 = smov 0   ;;  %s352_s0 = inlined_call_operand.vmem [shape: f32[2,16,256], index: 0, kind: input, shape index: {}, may-alias: {0,3}]   ;;  %s353_s1 = inlined_call_operand.vmem [shape: f32[16,1], index: 1, kind: input, shape index: {}]   ;;  %s354_s2 = inlined_call_operand.vmem [shape: f32[16,1], index: 2, kind: input, shape index: {}]   ;;  %s355_s3 = inlined_call_operand.vmem [shape: f32[2,16,256], index: 3, kind: output, shape index: {}, may-alias: {0,3}]  }
   0x1 LB: > { %s270_s13 = sadd.s32 4294967295, %s300_s12   ;;  %p274_p0 = scmp.ge.s32.totalorder %s300_s12, 1  ;;  %s300_s12 = sphi %s323_s12, %s13_s12  }
   0x2   : > { %p137_p1 = scmp.lt.s32.totalorder %s300_s12, 3 }
   0x4   : > { %p138_p2 = pnand %p274_p0, %p137_p1 }
   0x5   : > { %p161_p3 = scmp.lt.s32.totalorder (!%p138_p2), %s270_s13, 1 }
   0x6   : > { %141 = sbr.rel (%p138_p2) target bundleno = 148 (0x94), region = 32 }
   0xb   : > { %v191_v0 = vld [vmem:[%s354_s2] sm:$0xff]  ;;  %v302_v2 = vmov 0   ;;  %v192_v3 = vld [vmem:[%s354_s2 + $0x8] sm:$0xff]  ;;  %s357_s13 = smov (!%p161_p3, %s270_s13), 1 }
   0xc   : > { %v175_v1 = vld [vmem:[%s353_s1] sm:$0xff]  ;;  %293 = vset.pattern.permute.xlu1 %v302_v2  ;;  %292 = vset.pattern.permute.xlu0 %v302_v2  ;;  %v176_v4 = vld [vmem:[%s353_s1 + $0x8] sm:$0xff]  ;;  %s281_s22 = sshll.u32 %s357_s13, 5 }
   0xd   : > { %195 = vperm.xlu1 %293, %v191_v0   ;;  %179 = vperm.xlu0 %292, %v175_v1   ;;  %s165_s25 = scalar_lea.vmem %s352_s0, %s281_s22  ;;  %s170_s28 = scalar_lea.vmem %s355_s3, %s281_s22 }
   0xe   : > { %v171_v5 = vld [vmem:[%s165_s25] sm:$0xff]  ;;  %v172_v6 = vld [vmem:[%s165_s25 + $0x8] sm:$0xff]  ;;  %v173_v11 = vld [vmem:[%s165_s25 + $0x10] sm:$0xff] }
   0xf   : > { %v174_v12 = vld [vmem:[%s165_s25 + $0x18] sm:$0xff] }
  0x11   : > { %200 = vperm.xlu1 %293, %v192_v3   ;;  %184 = vperm.xlu0 %292, %v176_v4  }
  0x88   : > { %v196_v7 = vpop.permute.xlu1 %195  ;;  %v180_v8 = vpop.permute.xlu0 %179 }
  0x89   : > { %v187_v9 = vmul.f32 %v180_v8, %v171_v5  ;;  %v188_v10 = vmul.f32 %v180_v8, %v172_v6 }
  0x8b   : > { %v203_v13 = vadd.f32 %v196_v7, %v187_v9  ;;  %v204_v14 = vadd.f32 %v196_v7, %v188_v10 }
  0x8c   : > { %v185_v15 = vpop.permute.xlu0 %184  ;;  %v201_v20 = vpop.permute.xlu1 %200 }
  0x8d   : > { %v207_v16 = vmax.f32 %v203_v13, 0.0  ;;  %v208_v17 = vmax.f32 %v204_v14, 0.0  ;;  %v189_v18 = vmul.f32 %v185_v15, %v173_v11  ;;  %v190_v19 = vmul.f32 %v185_v15, %v174_v12 }
  0x8f   : > { %v205_v21 = vadd.f32 %v201_v20, %v189_v18  ;;  %v206_v22 = vadd.f32 %v201_v20, %v190_v19  ;;  %211 = vst [vmem:[%s170_s28] sm:$0xff] %v207_v16  ;;  %212 = vst [vmem:[%s170_s28 + $0x8] sm:$0xff] %v208_v17 }
  0x91   : > { %v209_v23 = vmax.f32 %v205_v21, 0.0  ;;  %v210_v24 = vmax.f32 %v206_v22, 0.0 }
  0x93   : > { %213 = vst [vmem:[%s170_s28 + $0x10] sm:$0xff] %v209_v23  ;;  %214 = vst [vmem:[%s170_s28 + $0x18] sm:$0xff] %v210_v24 }
  0x94 PF: > { %s13_s12 = sadd.s32 1, %s300_s12  }
  0x95   : > { %p10_p4 = scmp.ge.s32.totalorder %s13_s12, 4  }
  0x97   :  { %12 = sbr.rel (!%p10_p4) target bundleno = 1 (0x1), region = 62 }

// kernel: double_conv_forward.4
= control target key start
LH: loop header
LB: loop body
LE: loop exit
PB: predicated region body
PF: predicated region fallthrough
CT: control target
= control target key end

     0   :  { %s1070_s24 = smov 0   ;;  %s1212_s0 = inlined_call_operand.vmem [shape: bf16[2,16,256], index: 0, kind: input, shape index: {}]   ;;  %s1213_s1 = inlined_call_operand.vmem [shape: bf16[16,144], index: 1, kind: input, shape index: {}]   ;;  %s1214_s2 = inlined_call_operand.vmem [shape: f32[16,1], index: 2, kind: input, shape index: {}]   ;;  %s1215_s3 = inlined_call_operand.vmem [shape: f32[16,1], index: 3, kind: input, shape index: {}]   ;;  %s1216_s4 = inlined_call_operand.vmem [shape: f32[1,256], index: 4, kind: input, shape index: {}]   ;;  %s1217_s5 = inlined_call_operand.vmem [shape: f32[1,256], index: 5, kind: input, shape index: {}]   ;;  %s1218_s6 = inlined_call_operand.vmem [shape: f32[2,16,256], index: 6, kind: output, shape index: {0}]   ;;  %s1219_s7 = inlined_call_operand.vmem [shape: f32[2,16,2], index: 7, kind: output, shape index: {1}]  }
   0x1 LB: > { %s940_s25 = sadd.s32 4294967295, %s1019_s24   ;;  %p944_p0 = scmp.ge.s32.totalorder %s1019_s24, 1  ;;  %s1019_s24 = sphi %s1070_s24, %s18_s24  }
   0x2   : > { %p240_p1 = scmp.lt.s32.totalorder %s1019_s24, 3 }
   0x4   : > { %p241_p2 = pnand %p944_p0, %p240_p1 }
   0x5   : > { %s1022_s11 = smov (!%p241_p2), 112   ;;  %s1023_s12 = smov (!%p241_p2), 113  }
   0x6   : > { %244 = sbr.rel (%p241_p2) target bundleno = 675 (0x2a3), region = 44  ;;  %s1024_s13 = smov (!%p241_p2), 127  }
   0x7   : > { %s1025_s14 = smov (!%p241_p2), 111   ;;  %p277_p3 = scmp.lt.s32.totalorder (!%p241_p2), %s940_s25, 1 }
   0x8   : > { %s1026_s23 = smov (!%p241_p2), 16   ;;  %s1027_s26 = smov (!%p241_p2), 1  }
   0x9   : > { %s1028_s27 = smov (!%p241_p2), 15   ;;  %s1029_s28 = smov (!%p241_p2), 17  }
   0xb   : > { %v315_v0 = vld [vmem:[%s1215_s3] sm:$0xff]  ;;  %vm342_vm0 = vcmask 134144   ;;  %v1021_v2 = vmov 0   ;;  %v316_v3 = vld [vmem:[%s1215_s3 + $0x8] sm:$0xff]  ;;  %vm335_vm1 = vcmask 1044344   ;;  %s1221_s25 = smov (!%p277_p3, %s940_s25), 1  ;;  %v365_v12 = vlaneseq }
   0xc   : > { %v299_v1 = vld [vmem:[%s1214_s2] sm:$0xff]  ;;  %1007 = vset.pattern.permute.xlu1 %v1021_v2  ;;  %1006 = vset.pattern.permute.xlu0 %v1021_v2  ;;  %343 = vst.msk [vmem:[#allocation2 + $0xc] sm:$0xf] %vm342_vm0, %v1021_v2  ;;  %344 = vst.msk [vmem:[#allocation2 + $0x1c] sm:$0xf] %vm342_vm0, %v1021_v2  ;;  %v300_v4 = vld [vmem:[%s1214_s2 + $0x8] sm:$0xff] }
   0xd   : > { %345 = vst.msk [vmem:[#allocation2 + $0x2c] sm:$0xf] %vm342_vm0, %v1021_v2  ;;  %346 = vst.msk [vmem:[#allocation2 + $0x3c] sm:$0xf] %vm342_vm0, %v1021_v2  ;;  %319 = vperm.xlu1 %1007, %v315_v0   ;;  %303 = vperm.xlu0 %1006, %v299_v1   ;;  %s980_s15 = sshll.u32 %s1221_s25, 4  ;;  %v366_v13 = vshrl.u32 %v365_v12, 7 }
   0xe   : > { %347 = vst.msk [vmem:[#allocation2 + $0x4c] sm:$0xf] %vm342_vm0, %v1021_v2  ;;  %348 = vst.msk [vmem:[#allocation2 + $0x5c] sm:$0xf] %vm342_vm0, %v1021_v2  ;;  %s281_s18 = scalar_lea.vmem %s1212_s0, %s980_s15  ;;  %v363_v19 = vld [vmem:[%s1216_s4] sm:$0x3]  ;;  %s291_s17 = scalar_lea.vmem %s1219_s7, %s980_s15 }
   0xf   : > { %336 = vst.msk [vmem:[#allocation2] sm:$0xf] %vm335_vm1, %v1021_v2  ;;  %337 = vst.msk [vmem:[#allocation2 + $0x10] sm:$0xf] %vm335_vm1, %v1021_v2  ;;  %v293_v14 = vld [vmem:[%s281_s18] sm:$0xff]  ;;  %v367_v17 = vsub.s32 0, %v366_v13 }
  0x10   : > { %338 = vst.msk [vmem:[#allocation2 + $0x20] sm:$0xf] %vm335_vm1, %v1021_v2  ;;  %339 = vst.msk [vmem:[#allocation2 + $0x30] sm:$0xf] %vm335_vm1, %v1021_v2  ;;  %v295_v15 = vunpack.c.l.bf16 %v293_v14  ;;  %v296_v16 = vunpack.c.h.bf16 %v293_v14  ;;  %v294_v18 = vld [vmem:[%s281_s18 + $0x8] sm:$0xff]  ;;  %v371_v20 = vsub.s32 1, %v366_v13 }
  0x11   : > { %324 = vperm.xlu1 %1007, %v316_v3   ;;  %308 = vperm.xlu0 %1006, %v300_v4   ;;  %340 = vst.msk [vmem:[#allocation2 + $0x40] sm:$0xf] %vm335_vm1, %v1021_v2  ;;  %341 = vst.msk [vmem:[#allocation2 + $0x50] sm:$0xf] %vm335_vm1, %v1021_v2  ;;  %v393_v21 = vld [vmem:[%s1217_s5] sm:$0x3]  ;;  %v297_v26 = vunpack.c.l.bf16 %v294_v18  ;;  %v298_v27 = vunpack.c.h.bf16 %v294_v18  ;;  %v368_v28 = vrot.slane %v363_v19, %v367_v17 }
  0x12   : > { %v372_v29 = vrot.slane %v363_v19, %v371_v20  ;;  %v398_v30 = vrot.slane %v393_v21, %v367_v17  ;;  %v402_v33 = vrot.slane %v393_v21, %v371_v20  ;;  %vm474_vm2 = vcmask 130048   ;;  %s981_s10 = sshll.u32 %s1221_s25, 5 }
  0x13   : > { %v603_v5 = vld [vmem:[#allocation2 + $0xc] sm:$0xf]  ;;  %v605_v6 = vld [vmem:[#allocation2 + $0x1c] sm:$0xf]  ;;  %vm443_vm3 = vcmask 1043456   ;;  %vm623_vm4 = vcmask 916480  }
  0x14   : > { %v574_v7 = vld [vmem:[#allocation2 + $0x2c] sm:$0xf]  ;;  %v576_v8 = vld [vmem:[#allocation2 + $0x3c] sm:$0xf]  ;;  %vm594_vm5 = vcmask 924672   ;;  %vm565_vm6 = vcmask 1039360  }
  0x15   : > { %612 = vrot.lane.b32.xlu1 %v603_v5, %s1022_s11  ;;  %v545_v9 = vld [vmem:[#allocation2 + $0x4c] sm:$0xf]  ;;  %v547_v10 = vld [vmem:[#allocation2 + $0x5c] sm:$0xf]  ;;  %vm532_vm7 = vcmask 7168   ;;  %vm503_vm8 = vcmask 121856  }
  0x16   : > { %v632_v11 = vld [vmem:[#allocation2 + $0x4c] sm:$0xf]  ;;  %vm445_vm9 = vcmask 138240   ;;  %vm652_vm10 = vcmask 908288   ;;  %vm849_vm11 = vcmask 15368  }
  0x19   : > { %616 = vrot.lane.b32.xlu1 %v605_v6, %s1022_s11 }
  0x1d   : > { %583 = vrot.lane.b32.xlu1 %v574_v7, %s1023_s12 }
  0x21   : > { %587 = vrot.lane.b32.xlu1 %v576_v8, %s1023_s12  ;;  %v634_v8 = vld [vmem:[#allocation2 + $0x5c] sm:$0xf] }
  0x25   : > { %554 = vrot.lane.b32.xlu1 %v545_v9, %s1024_s13 }
  0x29   : > { %558 = vrot.lane.b32.xlu1 %v547_v10, %s1024_s13 }
  0x2d   : > { %641 = vrot.lane.b32.xlu1 %v632_v11, %s1025_s14  ;;  %v1010_v11 = vld [vmem:[%s1213_s1 + $0x4] ss:$8 sps:$4 sm:$0xff]  }
  0x2e   : > { %977 = vmatprep.mubr.msk.bf16.mxu0 %vm474_vm2, %v1010_v11 }
  0x88   : > { %v304_v22 = vpop.permute.xlu0 %303  ;;  %v320_v23 = vpop.permute.xlu1 %319 }
  0x89   : > { %v311_v24 = vmul.f32 %v304_v22, %v295_v15  ;;  %v312_v25 = vmul.f32 %v304_v22, %v296_v16 }
  0x8b   : > { %v327_v31 = vadd.f32 %v320_v23, %v311_v24  ;;  %v328_v32 = vadd.f32 %v320_v23, %v312_v25 }
  0x8c   : > { %v309_v34 = vpop.permute.xlu0 %308  ;;  %v325_v43 = vpop.permute.xlu1 %324 }
  0x8d   : > { %v1115_v35 = vmax.f32 %v327_v31, 0.0  ;;  %v1117_v36 = vmax.f32 %v328_v32, 0.0  ;;  %v313_v37 = vmul.f32 %v309_v34, %v297_v26  ;;  %v314_v38 = vmul.f32 %v309_v34, %v298_v27 }
  0x8f   : > { %v983_v39 = vpack.c.bf16 %v1117_v36, %v1115_v35  ;;  %v375_v40 = vmul.f32 %v368_v28, %v1115_v35  ;;  %v376_v41 = vmul.f32 %v372_v29, %v1117_v36  ;;  %v405_v42 = vmul.f32 %v398_v30, %v1115_v35 }
  0x90   : > { %v406_v44 = vmul.f32 %v402_v33, %v1117_v36  ;;  %v329_v45 = vadd.f32 %v325_v43, %v313_v37  ;;  %v330_v46 = vadd.f32 %v325_v43, %v314_v38  ;;  %v613_v12 = vpop.permute.xlu1 %612 }
  0x91   : > { %361 = vst [vmem:[#allocation2 + $0x4] sm:$0xff] %v983_v39  ;;  %v985_v47 = vpack.c.bf16 %v376_v41, %v375_v40  ;;  %610 = vrot.lane.b32.xlu0 %v983_v39, %s1022_s11  ;;  %v619_v19 = vrot.slane %v613_v12, 4 }
  0x92   : > { %v987_v48 = vpack.c.bf16 %v406_v44, %v405_v42  ;;  %v1126_v49 = vmax.f32 %v329_v45, 0.0  ;;  %v1128_v50 = vmax.f32 %v330_v46, 0.0 }
  0x93   : > { %391 = vst [vmem:[#allocation2 + $0x24] sm:$0xff] %v985_v47 }
  0x94   : > { %421 = vst [vmem:[#allocation2 + $0x44] sm:$0xff] %v987_v48  ;;  %v984_v51 = vpack.c.bf16 %v1128_v50, %v1126_v49  ;;  %v377_v52 = vmul.f32 %v368_v28, %v1126_v49  ;;  %v378_v53 = vmul.f32 %v372_v29, %v1128_v50  ;;  %v407_v54 = vmul.f32 %v398_v30, %v1126_v49  ;;  %v617_v13 = vpop.permute.xlu1 %616 }
  0x95   : > { %v408_v55 = vmul.f32 %v402_v33, %v1128_v50  ;;  %v1011_v57 = vpack.c.bf16 %v1128_v50, %v1117_v36  ;;  %v1012_v58 = vpack.c.bf16 %v1126_v49, %v1115_v35  ;;  %v621_v22 = vrot.slane %v617_v13, 4 }
  0x96   : > { %362 = vst [vmem:[#allocation2 + $0x14] sm:$0xff] %v984_v51  ;;  %v986_v56 = vpack.c.bf16 %v378_v53, %v377_v52  ;;  %614 = vrot.lane.b32.xlu0 %v984_v51, %s1022_s11 }
  0x97   : > { %v988_v59 = vpack.c.bf16 %v408_v55, %v407_v54 }
  0x98   : > { %392 = vst [vmem:[#allocation2 + $0x34] sm:$0xff] %v986_v56  ;;  %v454_v60 = vld [vmem:[#allocation2 + $0x8] sm:$0xf]  ;;  %v453_v61 = vld [vmem:[#allocation2] sm:$0xff]  ;;  %v584_v14 = vpop.permute.xlu1 %583 }
  0x99   : > { %422 = vst [vmem:[#allocation2 + $0x54] sm:$0xff] %v988_v59  ;;  %463 = vrot.lane.b32.xlu1 %v454_v60, %s1026_s23  ;;  %v590_v39 = vrot.slane %v584_v14, 4 }
  0x9a   : > { %461 = vrot.lane.b32.xlu0 %v453_v61, %s1026_s23  ;;  %v512_v0 = vld [vmem:[#allocation2 + $0x28] sm:$0xf]  ;;  %v511_v5 = vld [vmem:[#allocation2 + $0x20] sm:$0xff] }
  0x9b   : > { %v483_v2 = vld [vmem:[#allocation2 + $0x48] sm:$0xf]  ;;  %v482_v9 = vld [vmem:[#allocation2 + $0x40] sm:$0xff] }
  0x9c   : > { %v424_v4 = vld [vmem:[#allocation2 + $0x28] sm:$0xf]  ;;  %v588_v15 = vpop.permute.xlu1 %587 }
  0x9d   : > { %v456_v62 = vld [vmem:[#allocation2 + $0x18] sm:$0xf]  ;;  %v455_v63 = vld [vmem:[#allocation2 + $0x10] sm:$0xff]  ;;  %v592_v42 = vrot.slane %v588_v15, 4 }
  0x9e   : > { %467 = vrot.lane.b32.xlu1 %v456_v62, %s1026_s23  ;;  %465 = vrot.lane.b32.xlu0 %v455_v63, %s1026_s23 }
  0x9f   : > { %v514_v1 = vld [vmem:[#allocation2 + $0x38] sm:$0xf]  ;;  %v513_v7 = vld [vmem:[#allocation2 + $0x30] sm:$0xff] }
  0xa0   : > { %v485_v3 = vld [vmem:[#allocation2 + $0x58] sm:$0xf]  ;;  %v484_v10 = vld [vmem:[#allocation2 + $0x50] sm:$0xff]  ;;  %v555_v16 = vpop.permute.xlu1 %554 }
  0xa1   : > { %v426_v6 = vld [vmem:[#allocation2 + $0x38] sm:$0xf]  ;;  %v561_v55 = vrot.slane %v555_v16, 4 }
  0xa2   : > { %521 = vrot.lane.b32.xlu1 %v512_v0, %s1027_s26  ;;  %581 = vrot.lane.b32.xlu0 %v985_v47, %s1023_s12 }
  0xa4   : > { %v559_v17 = vpop.permute.xlu1 %558 }
  0xa6   : > { %525 = vrot.lane.b32.xlu1 %v514_v1, %s1027_s26  ;;  %585 = vrot.lane.b32.xlu0 %v986_v56, %s1023_s12 }
  0xa8   : > { %v1152_v21 = vpop.permute.xlu1 %641 }
  0xaa   : > { %492 = vrot.lane.b32.xlu1 %v483_v2, %s1028_s27  ;;  %552 = vrot.lane.b32.xlu0 %v987_v48, %s1024_s13 }
  0xae   : > { %496 = vrot.lane.b32.xlu1 %v485_v3, %s1028_s27  ;;  %556 = vrot.lane.b32.xlu0 %v988_v59, %s1024_s13  ;;  %s286_s13 = scalar_lea.vmem %s1218_s6, %s981_s10 }
  0xb2   : > { %433 = vrot.lane.b32.xlu1 %v424_v4, %s1029_s28  ;;  %519 = vrot.lane.b32.xlu0 %v511_v5, %s1027_s26 }
  0xb6   : > { %437 = vrot.lane.b32.xlu1 %v426_v6, %s1029_s28  ;;  %523 = vrot.lane.b32.xlu0 %v513_v7, %s1027_s26 }
  0xba   : > { %490 = vrot.lane.b32.xlu0 %v482_v9, %s1028_s27  ;;  %645 = vrot.lane.b32.xlu1 %v634_v8, %s1025_s14 }
  0xbe   : > { %494 = vrot.lane.b32.xlu0 %v484_v10, %s1028_s27 }
  0xc2   : > { %431 = vrot.lane.b32.xlu0 %v511_v5, %s1029_s28 }
  0xc6   : > { %435 = vrot.lane.b32.xlu0 %v513_v7, %s1029_s28 }
  0xca   : > { %639 = vrot.lane.b32.xlu0 %v987_v48, %s1025_s14 }
  0xce   : > { %643 = vrot.lane.b32.xlu0 %v988_v59, %s1025_s14  ;;  %v563_v59 = vrot.slane %v559_v17, 4 }
 0x103   : > { %v611_v18 = vpop.permute.xlu0 %610 }
 0x104   : > { %v618_v20 = vrot.slane %v611_v18, 4 }
 0x106   : > { %v622_v25 = vsel %vm443_vm3, %v618_v20, %v619_v19 }
 0x107   : > { %v624_v29 = vsel %vm623_vm4, %v611_v18, %v622_v25 }
 0x108   : > { %v615_v23 = vpop.permute.xlu0 %614 }
 0x109   : > { %v620_v24 = vrot.slane %v615_v23, 4 }
 0x10b   : > { %v625_v26 = vsel %vm443_vm3, %v620_v24, %v621_v22  ;;  %v1156_v27 = vpop.permute.xlu1 %463 }
 0x10c   : > { %v1158_v28 = vpop.permute.xlu0 %461  ;;  %v626_v30 = vsel %vm623_vm4, %v615_v23, %v625_v26  ;;  %v470_v50 = vrot.slane %v1156_v27, 4 }
 0x10d   : > { %v974_v31 = vcombine.high %v624_v29, %v626_v30  ;;  %v973_v32 = vcombine.low %v624_v29, %v626_v30 }
 0x10f   : > { %783 = vmatprep.subr.bf16.mxu0 %v974_v31 }
 0x110   : > { %784 = vmatpush1.bf16.msra.mxu0 %v973_v32  ;;  %v1160_v33 = vpop.permute.xlu0 %465  ;;  %v1162_v34 = vpop.permute.xlu1 %467 }
 0x111   : > { %v472_v13 = vrot.slane %v1162_v34, 4  ;;  %v471_v17 = vrot.slane %v1160_v33, 4 }
 0x113   : > { %v476_v24 = vsel %vm443_vm3, %v471_v17, %v472_v13 }
 0x114   : > { %v582_v37 = vpop.permute.xlu0 %581  ;;  %v522_v40 = vpop.permute.xlu1 %521  ;;  %v477_v27 = vsel %vm474_vm2, %v1160_v33, %v476_v24 }
 0x115   : > { %v589_v38 = vrot.slane %v582_v37, 4  ;;  %v528_v6 = vrot.slane %v522_v40, 4 }
 0x117   : > { %v593_v43 = vsel %vm443_vm3, %v589_v38, %v590_v39 }
 0x118   : > { %v586_v41 = vpop.permute.xlu0 %585  ;;  %v595_v46 = vsel %vm594_vm5, %v582_v37, %v593_v43  ;;  %v526_v54 = vpop.permute.xlu1 %525 }
 0x119   : > { %v591_v44 = vrot.slane %v586_v41, 4  ;;  %v530_v8 = vrot.slane %v526_v54, 4 }
 0x11b   : > { %v596_v45 = vsel %vm443_vm3, %v591_v44, %v592_v42 }
 0x11c   : > { %v597_v47 = vsel %vm594_vm5, %v586_v41, %v596_v45  ;;  %v553_v48 = vpop.permute.xlu0 %552  ;;  %v493_v63 = vpop.permute.xlu1 %492 }
 0x11d   : > { %v971_v51 = vcombine.low %v595_v46, %v597_v47  ;;  %v972_v52 = vcombine.high %v595_v46, %v597_v47  ;;  %v560_v53 = vrot.slane %v553_v48, 4  ;;  %v499_v20 = vrot.slane %v493_v63, 4 }
 0x11f   : > { %785 = vmatprep.subr.bf16.mxu0 %v972_v52  ;;  %v564_v60 = vsel %vm443_vm3, %v560_v53, %v561_v55  ;;  %v648_v55 = vrot.slane %v1152_v21, 4  ;;  %v1008_v21 = vld [vmem:[%s1213_s1] ss:$8 sps:$4 sm:$0xff]  }
 0x120   : > { %786 = vmatpush1.bf16.msra.mxu0 %v971_v51  ;;  %v557_v56 = vpop.permute.xlu0 %556  ;;  %v566_v0 = vsel %vm565_vm6, %v553_v48, %v564_v60  ;;  %v497_v11 = vpop.permute.xlu1 %496 }
 0x121   : > { %v562_v61 = vrot.slane %v557_v56, 4  ;;  %v501_v35 = vrot.slane %v497_v11, 4 }
 0x123   : > { %v567_v62 = vsel %vm443_vm3, %v562_v61, %v563_v59 }
 0x124   : > { %v568_v1 = vsel %vm565_vm6, %v557_v56, %v567_v62  ;;  %v520_v2 = vpop.permute.xlu0 %519  ;;  %v434_v22 = vpop.permute.xlu1 %433 }
 0x125   : > { %v969_v3 = vcombine.low %v566_v0, %v568_v1  ;;  %v970_v4 = vcombine.high %v566_v0, %v568_v1  ;;  %v527_v5 = vrot.slane %v520_v2, 4  ;;  %v440_v41 = vrot.slane %v434_v22, 4 }
 0x127   : > { %787 = vmatprep.subr.bf16.mxu0 %v970_v4  ;;  %v531_v9 = vsel %vm443_vm3, %v527_v5, %v528_v6 }
 0x128   : > { %788 = vmatpush1.bf16.msra.mxu0 %v969_v3  ;;  %v524_v7 = vpop.permute.xlu0 %523  ;;  %v533_v14 = vsel %vm532_vm7, %v520_v2, %v531_v9  ;;  %v438_v39 = vpop.permute.xlu1 %437 }
 0x129   : > { %v529_v10 = vrot.slane %v524_v7, 4  ;;  %789 = vmatprep.subr.bf16.mxu0 %v1011_v57  ;;  %v469_v57 = vrot.slane %v1158_v28, 4  ;;  %v442_v43 = vrot.slane %v438_v39, 4 }
 0x12b   : > { %v534_v12 = vsel %vm443_vm3, %v529_v10, %v530_v8  ;;  %v473_v25 = vsel %vm443_vm3, %v469_v57, %v470_v50 }
 0x12c   : > { %v535_v15 = vsel %vm532_vm7, %v524_v7, %v534_v12  ;;  %790 = vmatpush1.bf16.msra.mxu0 %v1012_v58  ;;  %v491_v16 = vpop.permute.xlu0 %490  ;;  %v475_v38 = vsel %vm474_vm2, %v1158_v28, %v473_v25  ;;  %v646_v28 = vpop.permute.xlu1 %645 }
 0x12d   : > { %v965_v18 = vcombine.low %v533_v14, %v535_v15  ;;  %v966_v19 = vcombine.high %v533_v14, %v535_v15  ;;  %v498_v36 = vrot.slane %v491_v16, 4  ;;  %v962_v40 = vcombine.high %v475_v38, %v477_v27 }
 0x12e   : > { %v961_v45 = vcombine.low %v475_v38, %v477_v27  ;;  %v650_v56 = vrot.slane %v646_v28, 4 }
 0x12f   : > { %791 = vmatprep.subr.bf16.mxu0 %v966_v19  ;;  %v502_v49 = vsel %vm443_vm3, %v498_v36, %v499_v20 }
 0x130   : > { %792 = vmatpush1.bf16.msra.mxu0 %v965_v18  ;;  %v495_v23 = vpop.permute.xlu0 %494  ;;  %v504_v29 = vsel %vm503_vm8, %v491_v16, %v502_v49 }
 0x131   : > { %v500_v58 = vrot.slane %v495_v23, 4 }
 0x133   : > { %v505_v26 = vsel %vm443_vm3, %v500_v58, %v501_v35 }
 0x134   : > { %v506_v30 = vsel %vm503_vm8, %v495_v23, %v505_v26  ;;  %v432_v31 = vpop.permute.xlu0 %431 }
 0x135   : > { %v963_v32 = vcombine.low %v504_v29, %v506_v30  ;;  %v964_v34 = vcombine.high %v504_v29, %v506_v30  ;;  %v439_v37 = vrot.slane %v432_v31, 4 }
 0x137   : > { %793 = vmatprep.subr.bf16.mxu0 %v964_v34  ;;  %v444_v44 = vsel %vm443_vm3, %v439_v37, %v440_v41 }
 0x138   : > { %794 = vmatpush1.bf16.msra.mxu0 %v963_v32  ;;  %v436_v42 = vpop.permute.xlu0 %435  ;;  %v446_v47 = vsel %vm445_vm9, %v432_v31, %v444_v44 }
 0x139   : > { %v441_v33 = vrot.slane %v436_v42, 4  ;;  %795 = vmatprep.subr.bf16.mxu0 %v962_v40 }
 0x13b   : > { %v447_v46 = vsel %vm443_vm3, %v441_v33, %v442_v43 }
 0x13c   : > { %v448_v48 = vsel %vm445_vm9, %v436_v42, %v447_v46  ;;  %796 = vmatpush1.bf16.msra.mxu0 %v961_v45  ;;  %v640_v51 = vpop.permute.xlu0 %639 }
 0x13d   : > { %v959_v52 = vcombine.low %v446_v47, %v448_v48  ;;  %v960_v53 = vcombine.high %v446_v47, %v448_v48  ;;  %v647_v54 = vrot.slane %v640_v51, 4 }
 0x13f   : > { %797 = vmatprep.subr.bf16.mxu0 %v960_v53  ;;  %v651_v60 = vsel %vm443_vm3, %v647_v54, %v648_v55 }
 0x140   : > { %798 = vmatpush1.bf16.msra.mxu0 %v959_v52  ;;  %v644_v59 = vpop.permute.xlu0 %643  ;;  %v653_v63 = vsel %vm652_vm10, %v640_v51, %v651_v60 }
 0x141   : > { %v649_v61 = vrot.slane %v644_v59, 4 }
 0x143   : > { %v654_v62 = vsel %vm443_vm3, %v649_v61, %v650_v56 }
 0x144   : > { %v655_v0 = vsel %vm652_vm10, %v644_v59, %v654_v62 }
 0x145   : > { %v975_v1 = vcombine.low %v653_v63, %v655_v0  ;;  %v976_v2 = vcombine.high %v653_v63, %v655_v0 }
 0x147   : > { %813 = vmatprep.subr.bf16.mxu0 %v976_v2 }
 0x148   : > { %814 = vmatpush2.bf16.msra.mxu0 %v975_v1 }
 0x14b   : > { %816 = vmatmul.mubr.bf16.vlgmr.msra.gmra.mxu0 %v1008_v21 }
 0x20b   : > { %v817_v3 = vpop.f32.mrf.mxu0 }
 0x20c   : > { %826 = vst [vmem:[%s286_s13] sm:$0xff] %v817_v3  ;;  %v839_v8 = vmul.f32 %v817_v3, %v817_v3 }
 0x20d   : > { %v819_v4 = vpop.f32.mrf.mxu0 }
 0x20e   : > { %827 = vst [vmem:[%s286_s13 + $0x8] sm:$0xff] %v819_v4  ;;  %v830_v5 = vadd.f32 %v819_v4, %v817_v3  ;;  %v840_v6 = vmul.f32 %v819_v4, %v819_v4 }
 0x20f   : > { %v821_v7 = vpop.f32.mrf.mxu0 }
 0x210   : > { %828 = vst [vmem:[%s286_s13 + $0x10] sm:$0xff] %v821_v7  ;;  %831 = vadd.xlane.f32.xlu0 %v830_v5  ;;  %v843_v11 = vadd.f32 %v840_v6, %v839_v8  ;;  %v841_v13 = vmul.f32 %v821_v7, %v821_v7 }
 0x211   : > { %v823_v9 = vpop.f32.mrf.mxu0 }
 0x212   : > { %829 = vst [vmem:[%s286_s13 + $0x18] sm:$0xff] %v823_v9  ;;  %v842_v10 = vmul.f32 %v823_v9, %v823_v9  ;;  %v833_v12 = vadd.f32 %v823_v9, %v821_v7 }
 0x214   : > { %844 = vadd.xlane.f32.xlu0 %v843_v11  ;;  %834 = vadd.xlane.f32.xlu1 %v833_v12  ;;  %v846_v14 = vadd.f32 %v842_v10, %v841_v13 }
 0x218   : > { %847 = vadd.xlane.f32.xlu0 %v846_v14 }
 0x299   : > { %v832_v15 = vpop.xlane.xlu0 %831 }
 0x29a   : > { %837 = vst.msk [vmem:[%s291_s17] sm:$0xff] %vm532_vm7, %v832_v15 }
 0x29d   : > { %v845_v16 = vpop.xlane.xlu0 %844  ;;  %v835_v17 = vpop.xlane.xlu1 %834 }
 0x29e   : > { %850 = vst.msk [vmem:[%s291_s17] sm:$0xff] %vm849_vm11, %v845_v16 }
 0x29f   : > { %838 = vst.msk [vmem:[%s291_s17 + $0x8] sm:$0xff] %vm532_vm7, %v835_v17 }
 0x2a1   : > { %v848_v18 = vpop.xlane.xlu0 %847 }
 0x2a2   : > { %851 = vst.msk [vmem:[%s291_s17 + $0x8] sm:$0xff] %vm849_vm11, %v848_v18 }
 0x2a3 PF: > { %s18_s24 = sadd.s32 1, %s1019_s24  }
 0x2a4   : > { %p15_p4 = scmp.ge.s32.totalorder %s18_s24, 4  }
 0x2a6   :  { %17 = sbr.rel (!%p15_p4) target bundleno = 1 (0x1), region = 86 }

// kernel: double_conv_forward.3
= control target key start
LH: loop header
LB: loop body
LE: loop exit
PB: predicated region body
PF: predicated region fallthrough
CT: control target
= control target key end

     0   :  { %s980_s18 = smov 0   ;;  %s1078_s0 = inlined_call_operand.vmem [shape: f32[2,16,256], index: 0, kind: input, shape index: {}]   ;;  %s1079_s1 = inlined_call_operand.vmem [shape: bf16[16,144], index: 1, kind: input, shape index: {}]   ;;  %s1080_s2 = inlined_call_operand.vmem [shape: f32[1,256], index: 2, kind: input, shape index: {}]   ;;  %s1081_s3 = inlined_call_operand.vmem [shape: f32[1,256], index: 3, kind: input, shape index: {}]   ;;  %s1082_s4 = inlined_call_operand.vmem [shape: bf16[2,16,256], index: 4, kind: output, shape index: {0}]   ;;  %s1083_s5 = inlined_call_operand.vmem [shape: f32[2,16,2], index: 5, kind: output, shape index: {1}]  }
   0x1 LB: > { %s858_s19 = sadd.s32 4294967295, %s939_s18   ;;  %p862_p0 = scmp.ge.s32.totalorder %s939_s18, 1  ;;  %s939_s18 = sphi %s980_s18, %s16_s18  }
   0x2   : > { %p190_p1 = scmp.lt.s32.totalorder %s939_s18, 3 }
   0x4   : > { %p191_p2 = pnand %p862_p0, %p190_p1 }
   0x5   : > { %p223_p3 = scmp.lt.s32.totalorder (!%p191_p2), %s858_s19, 1  ;;  %s942_s28 = smov (!%p191_p2), 112  }
   0x6   : > { %194 = sbr.rel (%p191_p2) target bundleno = 549 (0x225), region = 36  ;;  %s943_s29 = smov (!%p191_p2), 113  }
   0x7   : > { %s944_s30 = smov (!%p191_p2), 127   ;;  %s945_s6 = smov (!%p191_p2), 1  }
   0x8   : > { %s946_s7 = smov (!%p191_p2), 15   ;;  %s947_s8 = smov (!%p191_p2), 16  }
   0x9   : > { %s948_s9 = smov (!%p191_p2), 17   ;;  %s949_s12 = smov (!%p191_p2), 111  }
   0xb   : > { %vm250_vm0 = vcmask 134144   ;;  %v273_v0 = vlaneseq  ;;  %v941_v1 = vmov 0   ;;  %vm243_vm1 = vcmask 1044344   ;;  %s1085_s19 = smov (!%p223_p3, %s858_s19), 1  ;;  %v271_v3 = vld [vmem:[%s1080_s2] sm:$0x3] }
   0xc   : > { %252 = vst.msk [vmem:[#allocation2 + $0x1c] sm:$0xf] %vm250_vm0, %v941_v1  ;;  %251 = vst.msk [vmem:[#allocation2 + $0xc] sm:$0xf] %vm250_vm0, %v941_v1  ;;  %v301_v4 = vld [vmem:[%s1081_s3] sm:$0x3] }
   0xd   : > { %253 = vst.msk [vmem:[#allocation2 + $0x2c] sm:$0xf] %vm250_vm0, %v941_v1  ;;  %254 = vst.msk [vmem:[#allocation2 + $0x3c] sm:$0xf] %vm250_vm0, %v941_v1  ;;  %v274_v2 = vshrl.u32 %v273_v0, 7  ;;  %s900_s24 = sshll.u32 %s1085_s19, 5 }
   0xe   : > { %255 = vst.msk [vmem:[#allocation2 + $0x4c] sm:$0xf] %vm250_vm0, %v941_v1  ;;  %256 = vst.msk [vmem:[#allocation2 + $0x5c] sm:$0xf] %vm250_vm0, %v941_v1  ;;  %s227_s27 = scalar_lea.vmem %s1078_s0, %s900_s24  ;;  %v930_v52 = vld [vmem:[%s1079_s1 + $0x4] ss:$8 sps:$4 sm:$0xff]  }
   0xf   : > { %246 = vst.msk [vmem:[#allocation2 + $0x20] sm:$0xf] %vm243_vm1, %v941_v1  ;;  %244 = vst.msk [vmem:[#allocation2] sm:$0xf] %vm243_vm1, %v941_v1  ;;  %v275_v5 = vsub.s32 0, %v274_v2  ;;  %v279_v6 = vsub.s32 1, %v274_v2 }
  0x10   : > { %245 = vst.msk [vmem:[#allocation2 + $0x10] sm:$0xf] %vm243_vm1, %v941_v1  ;;  %247 = vst.msk [vmem:[#allocation2 + $0x30] sm:$0xf] %vm243_vm1, %v941_v1  ;;  %v1000_v11 = vld [vmem:[%s227_s27] sm:$0xff]  ;;  %v1002_v12 = vld [vmem:[%s227_s27 + $0x8] sm:$0xff] }
  0x11   : > { %248 = vst.msk [vmem:[#allocation2 + $0x40] sm:$0xf] %vm243_vm1, %v941_v1  ;;  %249 = vst.msk [vmem:[#allocation2 + $0x50] sm:$0xf] %vm243_vm1, %v941_v1  ;;  %v276_v7 = vrot.slane %v271_v3, %v275_v5  ;;  %v280_v8 = vrot.slane %v271_v3, %v279_v6  ;;  %v306_v9 = vrot.slane %v301_v4, %v275_v5  ;;  %v1004_v13 = vld [vmem:[%s227_s27 + $0x10] sm:$0xff]  ;;  %v1013_v20 = vld [vmem:[%s227_s27 + $0x18] sm:$0xff] }
  0x12   : > { %v310_v10 = vrot.slane %v301_v4, %v279_v6  ;;  %v903_v16 = vpack.c.bf16 %v1002_v12, %v1000_v11  ;;  %v904_v26 = vpack.c.bf16 %v1013_v20, %v1004_v13  ;;  %v931_v35 = vpack.c.bf16 %v1013_v20, %v1002_v12  ;;  %s901_s15 = sshll.u32 %s1085_s19, 4 }
  0x13   : > { %v513_v14 = vld [vmem:[#allocation2 + $0x1c] sm:$0xf]  ;;  %v511_v15 = vld [vmem:[#allocation2 + $0xc] sm:$0xf]  ;;  %v283_v17 = vmul.f32 %v276_v7, %v1000_v11  ;;  %v284_v18 = vmul.f32 %v280_v8, %v1002_v12  ;;  %v285_v19 = vmul.f32 %v276_v7, %v1004_v13  ;;  %v313_v21 = vmul.f32 %v306_v9, %v1000_v11  ;;  %s232_s20 = scalar_lea.vmem %s1082_s4, %s901_s15  ;;  %s237_s22 = scalar_lea.vmem %s1083_s5, %s901_s15 }
  0x14   : > { %524 = vrot.lane.b32.xlu1 %v513_v14, %s942_s28  ;;  %520 = vrot.lane.b32.xlu0 %v511_v15, %s942_s28  ;;  %v314_v22 = vmul.f32 %v310_v10, %v1002_v12  ;;  %v315_v23 = vmul.f32 %v306_v9, %v1004_v13  ;;  %v482_v24 = vld [vmem:[#allocation2 + $0x2c] sm:$0xf]  ;;  %269 = vst [vmem:[#allocation2 + $0x4] sm:$0xff] %v903_v16  ;;  %270 = vst [vmem:[#allocation2 + $0x14] sm:$0xff] %v904_v26  ;;  %v484_v32 = vld [vmem:[#allocation2 + $0x3c] sm:$0xf] }
  0x15   : > { %v905_v25 = vpack.c.bf16 %v284_v18, %v283_v17  ;;  %v286_v27 = vmul.f32 %v280_v8, %v1013_v20  ;;  %v316_v28 = vmul.f32 %v310_v10, %v1013_v20  ;;  %v453_v33 = vld [vmem:[#allocation2 + $0x4c] sm:$0xf]  ;;  %v455_v34 = vld [vmem:[#allocation2 + $0x5c] sm:$0xf]  ;;  %v932_v36 = vpack.c.bf16 %v1004_v13, %v1000_v11 }
  0x16   : > { %v907_v29 = vpack.c.bf16 %v314_v22, %v313_v21  ;;  %v540_v51 = vld [vmem:[#allocation2 + $0x4c] sm:$0xf]  ;;  %vm382_vm2 = vcmask 130048   ;;  %v542_v53 = vld [vmem:[#allocation2 + $0x5c] sm:$0xf]  ;;  %vm351_vm3 = vcmask 1043456  }
  0x17   : > { %299 = vst [vmem:[#allocation2 + $0x24] sm:$0xff] %v905_v25  ;;  %v906_v30 = vpack.c.bf16 %v286_v27, %v285_v19  ;;  %v1022_v31 = vpack.c.bf16 %v316_v28, %v315_v23  ;;  %895 = vmatprep.mubr.msk.bf16.mxu0 %vm382_vm2, %v930_v52  ;;  %vm531_vm4 = vcmask 916480   ;;  %vm502_vm5 = vcmask 924672  }
  0x18   : > { %491 = vrot.lane.b32.xlu1 %v482_v24, %s943_s29  ;;  %518 = vrot.lane.b32.xlu0 %v903_v16, %s942_s28  ;;  %329 = vst [vmem:[#allocation2 + $0x44] sm:$0xff] %v907_v29  ;;  %vm473_vm6 = vcmask 1039360   ;;  %vm440_vm7 = vcmask 7168   ;;  %vm411_vm8 = vcmask 121856   ;;  %vm353_vm9 = vcmask 138240  }
  0x19   : > { %300 = vst [vmem:[#allocation2 + $0x34] sm:$0xff] %v906_v30  ;;  %330 = vst [vmem:[#allocation2 + $0x54] sm:$0xff] %v1022_v31  ;;  %vm560_vm10 = vcmask 908288   ;;  %vm767_vm11 = vcmask 15368  }
  0x1b   : > { %v362_v45 = vld [vmem:[#allocation2 + $0x8] sm:$0xf]  ;;  %v361_v46 = vld [vmem:[#allocation2] sm:$0xff]  ;;  %v364_v47 = vld [vmem:[#allocation2 + $0x18] sm:$0xf] }
  0x1c   : > { %495 = vrot.lane.b32.xlu1 %v484_v32, %s943_s29  ;;  %489 = vrot.lane.b32.xlu0 %v905_v25, %s943_s29  ;;  %v363_v48 = vld [vmem:[#allocation2 + $0x10] sm:$0xff] }
  0x1e   : > { %v420_v37 = vld [vmem:[#allocation2 + $0x28] sm:$0xf]  ;;  %v419_v38 = vld [vmem:[#allocation2 + $0x20] sm:$0xff] }
  0x1f   : > { %v391_v41 = vld [vmem:[#allocation2 + $0x48] sm:$0xf]  ;;  %v390_v42 = vld [vmem:[#allocation2 + $0x40] sm:$0xff] }
  0x20   : > { %462 = vrot.lane.b32.xlu1 %v453_v33, %s944_s30  ;;  %493 = vrot.lane.b32.xlu0 %v906_v30, %s943_s29  ;;  %v422_v39 = vld [vmem:[#allocation2 + $0x38] sm:$0xf]  ;;  %v421_v40 = vld [vmem:[#allocation2 + $0x30] sm:$0xff]  ;;  %v332_v49 = vld [vmem:[#allocation2 + $0x28] sm:$0xf] }
  0x21   : > { %v393_v43 = vld [vmem:[#allocation2 + $0x58] sm:$0xf]  ;;  %v392_v44 = vld [vmem:[#allocation2 + $0x50] sm:$0xff] }
  0x22   : > { %v334_v50 = vld [vmem:[#allocation2 + $0x38] sm:$0xf] }
  0x24   : > { %522 = vrot.lane.b32.xlu1 %v904_v26, %s942_s28  ;;  %460 = vrot.lane.b32.xlu0 %v907_v29, %s944_s30 }
  0x28   : > { %466 = vrot.lane.b32.xlu1 %v455_v34, %s944_s30  ;;  %464 = vrot.lane.b32.xlu0 %v1022_v31, %s944_s30 }
  0x2c   : > { %429 = vrot.lane.b32.xlu1 %v420_v37, %s945_s6  ;;  %427 = vrot.lane.b32.xlu0 %v419_v38, %s945_s6 }
  0x30   : > { %433 = vrot.lane.b32.xlu1 %v422_v39, %s945_s6  ;;  %431 = vrot.lane.b32.xlu0 %v421_v40, %s945_s6 }
  0x34   : > { %400 = vrot.lane.b32.xlu1 %v391_v41, %s946_s7  ;;  %398 = vrot.lane.b32.xlu0 %v390_v42, %s946_s7 }
  0x38   : > { %404 = vrot.lane.b32.xlu1 %v393_v43, %s946_s7  ;;  %402 = vrot.lane.b32.xlu0 %v392_v44, %s946_s7 }
  0x3c   : > { %371 = vrot.lane.b32.xlu1 %v362_v45, %s947_s8  ;;  %369 = vrot.lane.b32.xlu0 %v361_v46, %s947_s8 }
  0x40   : > { %375 = vrot.lane.b32.xlu1 %v364_v47, %s947_s8  ;;  %373 = vrot.lane.b32.xlu0 %v363_v48, %s947_s8 }
  0x44   : > { %341 = vrot.lane.b32.xlu1 %v332_v49, %s948_s9  ;;  %339 = vrot.lane.b32.xlu0 %v419_v38, %s948_s9 }
  0x48   : > { %345 = vrot.lane.b32.xlu1 %v334_v50, %s948_s9  ;;  %343 = vrot.lane.b32.xlu0 %v421_v40, %s948_s9 }
  0x4c   : > { %549 = vrot.lane.b32.xlu1 %v540_v51, %s949_s12  ;;  %547 = vrot.lane.b32.xlu0 %v907_v29, %s949_s12 }
  0x50   : > { %553 = vrot.lane.b32.xlu1 %v542_v53, %s949_s12  ;;  %551 = vrot.lane.b32.xlu0 %v1022_v31, %s949_s12 }
  0x86   : > { %v525_v54 = vpop.permute.xlu1 %524  ;;  %v521_v55 = vpop.permute.xlu0 %520 }
  0x87   : > { %v527_v0 = vrot.slane %v521_v55, 4  ;;  %v529_v3 = vrot.slane %v525_v54, 4 }
  0x8a   : > { %v492_v56 = vpop.permute.xlu1 %491  ;;  %v519_v57 = vpop.permute.xlu0 %518 }
  0x8b   : > { %v526_v62 = vrot.slane %v519_v57, 4  ;;  %v498_v6 = vrot.slane %v492_v56, 4 }
  0x8d   : > { %v530_v9 = vsel %vm351_vm3, %v526_v62, %v527_v0 }
  0x8e   : > { %v496_v58 = vpop.permute.xlu1 %495  ;;  %v490_v59 = vpop.permute.xlu0 %489  ;;  %v532_v18 = vsel %vm531_vm4, %v519_v57, %v530_v9 }
  0x8f   : > { %v500_v1 = vrot.slane %v496_v58, 4  ;;  %v497_v2 = vrot.slane %v490_v59, 4 }
  0x91   : > { %v501_v10 = vsel %vm351_vm3, %v497_v2, %v498_v6 }
  0x92   : > { %v463_v60 = vpop.permute.xlu1 %462  ;;  %v494_v61 = vpop.permute.xlu0 %493  ;;  %v503_v27 = vsel %vm502_vm5, %v490_v59, %v501_v10 }
  0x93   : > { %v499_v63 = vrot.slane %v494_v61, 4  ;;  %v469_v16 = vrot.slane %v463_v60, 4 }
  0x95   : > { %v504_v8 = vsel %vm351_vm3, %v499_v63, %v500_v1 }
  0x96   : > { %v523_v4 = vpop.permute.xlu1 %522  ;;  %v461_v5 = vpop.permute.xlu0 %460  ;;  %v505_v17 = vsel %vm502_vm5, %v494_v61, %v504_v8 }
  0x97   : > { %v528_v7 = vrot.slane %v523_v4, 4  ;;  %v468_v14 = vrot.slane %v461_v5, 4  ;;  %v890_v28 = vcombine.high %v503_v27, %v505_v17  ;;  %v889_v34 = vcombine.low %v503_v27, %v505_v17 }
  0x99   : > { %v533_v15 = vsel %vm351_vm3, %v528_v7, %v529_v3  ;;  %v472_v29 = vsel %vm351_vm3, %v468_v14, %v469_v16 }
  0x9a   : > { %v534_v19 = vsel %vm531_vm4, %v523_v4, %v533_v15  ;;  %v467_v21 = vpop.permute.xlu1 %466  ;;  %v465_v22 = vpop.permute.xlu0 %464  ;;  %v474_v37 = vsel %vm473_vm6, %v461_v5, %v472_v29 }
  0x9b   : > { %v892_v23 = vcombine.high %v532_v18, %v534_v19  ;;  %v471_v24 = vrot.slane %v467_v21, 4  ;;  %v891_v25 = vcombine.low %v532_v18, %v534_v19  ;;  %v470_v26 = vrot.slane %v465_v22, 4 }
  0x9d   : > { %691 = vmatprep.subr.bf16.mxu0 %v892_v23  ;;  %v475_v30 = vsel %vm351_vm3, %v470_v26, %v471_v24 }
  0x9e   : > { %692 = vmatpush1.bf16.msra.mxu0 %v891_v25  ;;  %v476_v31 = vsel %vm473_vm6, %v465_v22, %v475_v30  ;;  %v430_v32 = vpop.permute.xlu1 %429  ;;  %v428_v33 = vpop.permute.xlu0 %427 }
  0x9f   : > { %693 = vmatprep.subr.bf16.mxu0 %v890_v28  ;;  %v888_v38 = vcombine.high %v474_v37, %v476_v31  ;;  %v436_v39 = vrot.slane %v430_v32, 4  ;;  %v435_v40 = vrot.slane %v428_v33, 4  ;;  %v887_v45 = vcombine.low %v474_v37, %v476_v31 }
  0xa1   : > { %v439_v46 = vsel %vm351_vm3, %v435_v40, %v436_v39 }
  0xa2   : > { %694 = vmatpush1.bf16.msra.mxu0 %v889_v34  ;;  %v434_v41 = vpop.permute.xlu1 %433  ;;  %v432_v42 = vpop.permute.xlu0 %431  ;;  %v441_v53 = vsel %vm440_vm7, %v428_v33, %v439_v46 }
  0xa3   : > { %695 = vmatprep.subr.bf16.mxu0 %v888_v38  ;;  %v438_v43 = vrot.slane %v434_v41, 4  ;;  %v437_v44 = vrot.slane %v432_v42, 4 }
  0xa5   : > { %v442_v47 = vsel %vm351_vm3, %v437_v44, %v438_v43  ;;  %v928_v44 = vld [vmem:[%s1079_s1] ss:$8 sps:$4 sm:$0xff]  }
  0xa6   : > { %696 = vmatpush1.bf16.msra.mxu0 %v887_v45  ;;  %v443_v48 = vsel %vm440_vm7, %v432_v42, %v442_v47  ;;  %v401_v49 = vpop.permute.xlu1 %400  ;;  %v399_v50 = vpop.permute.xlu0 %398 }
  0xa7   : > { %697 = vmatprep.subr.bf16.mxu0 %v931_v35  ;;  %v407_v51 = vrot.slane %v401_v49, 4  ;;  %v406_v52 = vrot.slane %v399_v50, 4  ;;  %v884_v54 = vcombine.high %v441_v53, %v443_v48  ;;  %v883_v60 = vcombine.low %v441_v53, %v443_v48 }
  0xa9   : > { %v410_v57 = vsel %vm351_vm3, %v406_v52, %v407_v51 }
  0xaa   : > { %698 = vmatpush1.bf16.msra.mxu0 %v932_v36  ;;  %v405_v55 = vpop.permute.xlu1 %404  ;;  %v403_v56 = vpop.permute.xlu0 %402  ;;  %v412_v20 = vsel %vm411_vm8, %v399_v50, %v410_v57 }
  0xab   : > { %699 = vmatprep.subr.bf16.mxu0 %v884_v54  ;;  %v409_v58 = vrot.slane %v405_v55, 4  ;;  %v408_v59 = vrot.slane %v403_v56, 4 }
  0xad   : > { %v413_v12 = vsel %vm351_vm3, %v408_v59, %v409_v58 }
  0xae   : > { %v414_v35 = vsel %vm411_vm8, %v403_v56, %v413_v12  ;;  %700 = vmatpush1.bf16.msra.mxu0 %v883_v60  ;;  %v372_v61 = vpop.permute.xlu1 %371  ;;  %v370_v62 = vpop.permute.xlu0 %369 }
  0xaf   : > { %v881_v63 = vcombine.low %v412_v20, %v414_v35  ;;  %v882_v0 = vcombine.high %v412_v20, %v414_v35  ;;  %v378_v11 = vrot.slane %v372_v61, 4  ;;  %v377_v13 = vrot.slane %v370_v62, 4 }
  0xb1   : > { %701 = vmatprep.subr.bf16.mxu0 %v882_v0  ;;  %v381_v2 = vsel %vm351_vm3, %v377_v13, %v378_v11 }
  0xb2   : > { %702 = vmatpush1.bf16.msra.mxu0 %v881_v63  ;;  %v376_v36 = vpop.permute.xlu1 %375  ;;  %v374_v1 = vpop.permute.xlu0 %373  ;;  %v383_v6 = vsel %vm382_vm2, %v370_v62, %v381_v2 }
  0xb3   : > { %v380_v3 = vrot.slane %v376_v36, 4  ;;  %v379_v4 = vrot.slane %v374_v1, 4 }
  0xb5   : > { %v384_v5 = vsel %vm351_vm3, %v379_v4, %v380_v3 }
  0xb6   : > { %v385_v7 = vsel %vm382_vm2, %v374_v1, %v384_v5  ;;  %v342_v8 = vpop.permute.xlu1 %341  ;;  %v340_v9 = vpop.permute.xlu0 %339 }
  0xb7   : > { %v879_v10 = vcombine.low %v383_v6, %v385_v7  ;;  %v880_v14 = vcombine.high %v383_v6, %v385_v7  ;;  %v348_v15 = vrot.slane %v342_v8, 4  ;;  %v347_v16 = vrot.slane %v340_v9, 4 }
  0xb9   : > { %703 = vmatprep.subr.bf16.mxu0 %v880_v14  ;;  %v352_v19 = vsel %vm351_vm3, %v347_v16, %v348_v15 }
  0xba   : > { %v346_v17 = vpop.permute.xlu1 %345  ;;  %704 = vmatpush1.bf16.msra.mxu0 %v879_v10  ;;  %v344_v18 = vpop.permute.xlu0 %343  ;;  %v354_v24 = vsel %vm353_vm9, %v340_v9, %v352_v19 }
  0xbb   : > { %v350_v21 = vrot.slane %v346_v17, 4  ;;  %v349_v22 = vrot.slane %v344_v18, 4 }
  0xbd   : > { %v355_v23 = vsel %vm351_vm3, %v349_v22, %v350_v21 }
  0xbe   : > { %v356_v25 = vsel %vm353_vm9, %v344_v18, %v355_v23  ;;  %v550_v26 = vpop.permute.xlu1 %549  ;;  %v548_v27 = vpop.permute.xlu0 %547 }
  0xbf   : > { %v877_v28 = vcombine.low %v354_v24, %v356_v25  ;;  %v878_v29 = vcombine.high %v354_v24, %v356_v25  ;;  %v556_v30 = vrot.slane %v550_v26, 4  ;;  %v555_v31 = vrot.slane %v548_v27, 4 }
  0xc1   : > { %705 = vmatprep.subr.bf16.mxu0 %v878_v29  ;;  %v559_v34 = vsel %vm351_vm3, %v555_v31, %v556_v30 }
  0xc2   : > { %v554_v32 = vpop.permute.xlu1 %553  ;;  %706 = vmatpush1.bf16.msra.mxu0 %v877_v28  ;;  %v552_v33 = vpop.permute.xlu0 %551  ;;  %v561_v40 = vsel %vm560_vm10, %v548_v27, %v559_v34 }
  0xc3   : > { %v558_v37 = vrot.slane %v554_v32, 4  ;;  %v557_v38 = vrot.slane %v552_v33, 4 }
  0xc5   : > { %v562_v39 = vsel %vm351_vm3, %v557_v38, %v558_v37 }
  0xc6   : > { %v563_v41 = vsel %vm560_vm10, %v552_v33, %v562_v39 }
  0xc7   : > { %v893_v42 = vcombine.low %v561_v40, %v563_v41  ;;  %v894_v43 = vcombine.high %v561_v40, %v563_v41 }
  0xc9   : > { %721 = vmatprep.subr.bf16.mxu0 %v894_v43 }
  0xca   : > { %722 = vmatpush2.bf16.msra.mxu0 %v893_v42 }
  0xcd   : > { %724 = vmatmul.mubr.bf16.vlgmr.msra.gmra.mxu0 %v928_v44 }
 0x18d   : > { %v725_v45 = vpop.f32.mrf.mxu0 }
 0x18e   : > { %v757_v51 = vmul.f32 %v725_v45, %v725_v45 }
 0x18f   : > { %v727_v46 = vpop.f32.mrf.mxu0 }
 0x190   : > { %v909_v47 = vpack.c.bf16 %v727_v46, %v725_v45  ;;  %v748_v48 = vadd.f32 %v727_v46, %v725_v45  ;;  %v758_v49 = vmul.f32 %v727_v46, %v727_v46 }
 0x191   : > { %v729_v50 = vpop.f32.mrf.mxu0 }
 0x192   : > { %749 = vadd.xlane.f32.xlu0 %v748_v48  ;;  %746 = vst [vmem:[%s232_s20] sm:$0xff] %v909_v47  ;;  %v761_v55 = vadd.f32 %v758_v49, %v757_v51  ;;  %v759_v57 = vmul.f32 %v729_v50, %v729_v50 }
 0x193   : > { %v731_v52 = vpop.f32.mrf.mxu0 }
 0x194   : > { %v910_v53 = vpack.c.bf16 %v731_v52, %v729_v50  ;;  %v760_v54 = vmul.f32 %v731_v52, %v731_v52  ;;  %v751_v56 = vadd.f32 %v731_v52, %v729_v50 }
 0x196   : > { %747 = vst [vmem:[%s232_s20 + $0x8] sm:$0xff] %v910_v53  ;;  %762 = vadd.xlane.f32.xlu0 %v761_v55  ;;  %752 = vadd.xlane.f32.xlu1 %v751_v56  ;;  %v764_v58 = vadd.f32 %v760_v54, %v759_v57 }
 0x19a   : > { %765 = vadd.xlane.f32.xlu0 %v764_v58 }
 0x21b   : > { %v750_v59 = vpop.xlane.xlu0 %749 }
 0x21c   : > { %755 = vst.msk [vmem:[%s237_s22] sm:$0xff] %vm440_vm7, %v750_v59 }
 0x21f   : > { %v763_v60 = vpop.xlane.xlu0 %762  ;;  %v753_v12 = vpop.xlane.xlu1 %752 }
 0x220   : > { %768 = vst.msk [vmem:[%s237_s22] sm:$0xff] %vm767_vm11, %v763_v60 }
 0x221   : > { %756 = vst.msk [vmem:[%s237_s22 + $0x8] sm:$0xff] %vm440_vm7, %v753_v12 }
 0x223   : > { %v766_v20 = vpop.xlane.xlu0 %765 }
 0x224   : > { %769 = vst.msk [vmem:[%s237_s22 + $0x8] sm:$0xff] %vm767_vm11, %v766_v20 }
 0x225 PF: > { %s16_s18 = sadd.s32 1, %s939_s18  }
 0x226   : > { %p13_p4 = scmp.ge.s32.totalorder %s16_s18, 4  }
 0x228   :  { %15 = sbr.rel (!%p13_p4) target bundleno = 1 (0x1), region = 78 }

</bundles_post_ra>
